<compile_context>
chip_gen: v5e
topology: v5e:2x2
jax: 0.10.0
libtpu: 0.0.40
codegen_flags: <defaults>
</compile_context>

<pallas_src>
import numpy as np
import jax
import jax.numpy as jnp
from jax.experimental import pallas as pl
from jax.experimental.pallas import tpu as pltpu


# ConvTranspose2d(k=4, s=2, p=1) decomposed by output parity:
#   even output rows/cols: kernel tap 1 at shift 0, tap 3 at shift -1
#   odd  output rows/cols: kernel tap 2 at shift 0, tap 0 at shift +1
_TAPS = (((1, 0), (3, -1)),
         ((2, 0), (0, +1)))


def _make_kernel(block_n, H, W, K, Kp):
    HW = H * W
    PAD = W + 1               # covers flat shifts up to +/-(W+1)
    HWP = HW + 2 * PAD

    def kernel(x_ref, w_ref, b_ref, m_ref, out_ref, c_pad, y_pad, z_pad):
        # x_ref  : (block_n, Cin, HW)       f32
        # w_ref  : (16*Kp, Cin)             f32   row = (ky*4+kx)*Kp + k
        # b_ref  : (Kp, 1)                  f32
        # m_ref  : (4, HW)                  f32   rows: row0, rowlast, col0, collast
        # out_ref: (block_n, 4, 4, K, HW)   f32   out[b,q,p,k,m*W+r] = o[k,4m+q,4r+p]
        # c_pad  : (16*Kp, HWP) scratch  -- per-tap channel contractions (zero-padded)
        # y_pad  : (4*Kp,  HWP) scratch  -- deconv output parity planes (py,px)
        # z_pad  : (8*Kp,  HWP) scratch  -- row-upsampled planes (q, px)

        # zero scratch every grid step so the lane padding is always zero
        c_pad[...] = jnp.zeros(c_pad.shape, jnp.float32)
        y_pad[...] = jnp.zeros(y_pad.shape, jnp.float32)
        z_pad[...] = jnp.zeros(z_pad.shape, jnp.float32)

        r0 = m_ref[0:1, :]          # (1, HW) 1.0 on first row of the HxW grid
        rl = m_ref[1:2, :]          # last row
        c0 = m_ref[2:3, :]          # first column
        cl = m_ref[3:4, :]          # last column
        not_c0 = 1.0 - c0
        not_cl = 1.0 - cl

        def colmask(sx):
            if sx == 1:
                return not_cl
            if sx == -1:
                return not_c0
            return None

        bias = b_ref[...]           # (Kp, 1), broadcasts over HW

        for bi in range(block_n):
            # ---- stage 1a: channel contraction on the MXU -------------------
            # contrib[(ky*4+kx)*Kp + k, m*W + r] = sum_ci w[ci,k,ky,kx] * x[ci,m,r]
            xb = x_ref[bi]                                   # (Cin, HW)
            c_pad[:, PAD:PAD + HW] = jnp.dot(
                w_ref[...], xb, preferred_element_type=jnp.float32)

            # ---- stage 1b: transposed-conv parity assembly (VPU) ------------
            for py in range(2):
                for px in range(2):
                    acc = None
                    for (ky, sy) in _TAPS[py]:
                        for (kx, sx) in _TAPS[px]:
                            t = ky * 4 + kx
                            off = PAD + sy * W + sx
                            v = c_pad[t * Kp:(t + 1) * Kp, off:off + HW]
                            cm = colmask(sx)
                            if cm is not None:
                                v = v * cm
                            acc = v if acc is None else acc + v
                    row = (py * 2 + px) * Kp
                    y_pad[row:row + Kp, PAD:PAD + HW] = acc + bias

            # ---- stage 2a: bilinear x2 along rows (q = output row mod 4) ----
            for px in range(2):
                a0r = (0 * 2 + px) * Kp
                a1r = (1 * 2 + px) * Kp
                a0 = y_pad[a0r:a0r + Kp, PAD:PAD + HW]
                a1 = y_pad[a1r:a1r + Kp, PAD:PAD + HW]
                a1m = y_pad[a1r:a1r + Kp, PAD - W:PAD - W + HW]   # shifted -1 row
                a0p = y_pad[a0r:a0r + Kp, PAD + W:PAD + W + HW]   # shifted +1 row
                zq = (
                    0.75 * a0 + 0.25 * (a1m + r0 * a0),   # q = 0 (clamp at top)
                    0.75 * a0 + 0.25 * a1,                # q = 1
                    0.25 * a0 + 0.75 * a1,                # q = 2
                    0.75 * a1 + 0.25 * (a0p + rl * a1),   # q = 3 (clamp at bottom)
                )
                for q in range(4):
                    row = (q * 2 + px) * Kp
                    z_pad[row:row + Kp, PAD:PAD + HW] = zq[q]

            # ---- stage 2b: bilinear x2 along cols (p = output col mod 4) ----
            for q in range(4):
                b0r = (q * 2 + 0) * Kp
                b1r = (q * 2 + 1) * Kp
                b0 = z_pad[b0r:b0r + Kp, PAD:PAD + HW]
                b1 = z_pad[b1r:b1r + Kp, PAD:PAD + HW]
                b1m = z_pad[b1r:b1r + Kp, PAD - 1:PAD - 1 + HW] * not_c0
                b0p = z_pad[b0r:b0r + Kp, PAD + 1:PAD + 1 + HW] * not_cl
                o_planes = (
                    0.75 * b0 + 0.25 * (b1m + c0 * b0),   # p = 0 (clamp at left)
                    0.75 * b0 + 0.25 * b1,                # p = 1
                    0.25 * b0 + 0.75 * b1,                # p = 2
                    0.75 * b1 + 0.25 * (b0p + cl * b1),   # p = 3 (clamp at right)
                )
                for p in range(4):
                    out_ref[bi, q, p] = o_planes[p][:K, :]

    return kernel, HWP


def keypoint_rcnn_predictor(x, weight, bias, *, block_n=None):
    """x: (N, Cin, H, W) f32; weight: (Cin, K, 4, 4) f32 (PyTorch ConvTranspose2d layout);
    bias: (K,) f32.  Returns (N, K, 4H, 4W) f32, matching the PyTorch forward."""
    x = jnp.asarray(x, jnp.float32)
    weight = jnp.asarray(weight, jnp.float32)
    bias = jnp.asarray(bias, jnp.float32)

    N, Cin, H, W = x.shape
    K = weight.shape[1]
    HW = H * W
    Kp = ((K + 7) // 8) * 8

    # ---- pick images per grid step (amortize per-step overhead, fit VMEM) --
    if block_n is None:
        per_img_bytes = 4 * HW * (Cin + 16 * K)          # x block + out block, f32
        cap = max(1, (4 * 1024 * 1024) // per_img_bytes)
        limit = min(8, cap, 1 if N == 1 else max(1, N // 2))
        block_n = 1
        for bn in range(min(limit, N), 0, -1):
            if N % bn == 0:
                block_n = bn
                break
    grid = (N // block_n,)

    # ---- tiny one-off glue: weight regroup, bias pad, edge masks -----------
    # wmat[(ky*4+kx)*Kp + k, ci] = weight[ci, k, ky, kx]   (k >= K rows are zero)
    wmat = jnp.transpose(weight, (2, 3, 1, 0))           # (4, 4, K, Cin)
    wmat = jnp.pad(wmat, ((0, 0), (0, 0), (0, Kp - K), (0, 0)))
    wmat = wmat.reshape(16 * Kp, Cin)
    bias2 = jnp.pad(bias, (0, Kp - K)).reshape(Kp, 1)

    pos = np.arange(HW)
    row_i = pos // W
    col_i = pos % W
    masks = np.stack([row_i == 0, row_i == H - 1,
                      col_i == 0, col_i == W - 1]).astype(np.float32)
    masks = jnp.asarray(masks)                           # (4, HW)

    x_flat = x.reshape(N, Cin, HW)                       # free reshape (no transpose)

    kernel, HWP = _make_kernel(block_n, H, W, K, Kp)

    out_par = pl.pallas_call(
        kernel,
        out_shape=jax.ShapeDtypeStruct((N, 4, 4, K, HW), jnp.float32),
        grid=grid,
        in_specs=[
            pl.BlockSpec((block_n, Cin, HW), lambda i: (i, 0, 0)),
            pl.BlockSpec((16 * Kp, Cin), lambda i: (0, 0)),
            pl.BlockSpec((Kp, 1), lambda i: (0, 0)),
            pl.BlockSpec((4, HW), lambda i: (0, 0)),
        ],
        out_specs=pl.BlockSpec((block_n, 4, 4, K, HW),
                               lambda i: (i, 0, 0, 0, 0)),
        scratch_shapes=[
            pltpu.VMEM((16 * Kp, HWP), jnp.float32),
            pltpu.VMEM((4 * Kp, HWP), jnp.float32),
            pltpu.VMEM((8 * Kp, HWP), jnp.float32),
        ],
        compiler_params=pltpu.CompilerParams(
            dimension_semantics=("parallel",)),
    )(x_flat, wmat, bias2, masks)

    # single layout pass: (N,4,4,K,H,W) -> (N,K,4H,4W); reshapes are free.
    out = (out_par.reshape(N, 4, 4, K, H, W)
                  .transpose(0, 3, 4, 1, 5, 2)
                  .reshape(N, K, 4 * H, 4 * W))
    return out


# ---------------------------- pure-numpy reference ----------------------------
def _ref_forward(x, weight, bias):
    x = np.asarray(x, np.float64)
    w = np.asarray(weight, np.float64)
    b = np.asarray(bias, np.float64)
    N, C, H, W = x.shape
    K = w.shape[1]
    y = np.zeros((N, K, 2 * H, 2 * W), np.float64)
    for ky in range(4):
        for kx in range(4):
            contrib = np.einsum("nchw,ck->nkhw", x, w[:, :, ky, kx])
            for iy in range(H):
                oy = 2 * iy - 1 + ky
                if not (0 <= oy < 2 * H):
                    continue
                for ix in range(W):
                    ox = 2 * ix - 1 + kx
                    if not (0 <= ox < 2 * W):
                        continue
                    y[:, :, oy, ox] += contrib[:, :, iy, ix]
    y += b.reshape(1, K, 1, 1)

    def up1d(arr, axis):
        S = arr.shape[axis]
        dst = np.arange(2 * S)
        src = np.clip((dst + 0.5) / 2.0 - 0.5, 0.0, None)
        i0 = np.floor(src).astype(np.int64)
        i1 = np.minimum(i0 + 1, S - 1)
        w1 = src - i0
        w0 = 1.0 - w1
        a0 = np.take(arr, i0, axis=axis)
        a1 = np.take(arr, i1, axis=axis)
        shape = [1] * arr.ndim
        shape[axis] = 2 * S
        return a0 * w0.reshape(shape) + a1 * w1.reshape(shape)

    y = up1d(y, 2)
    y = up1d(y, 3)
    return y


if __name__ == "__main__":
    key = jax.random.PRNGKey(0)

    # ---- test 1: module-like toy shapes, zero bias (as in the PyTorch init) ----
    N, Cin, H, W = 2, 4, 16, 16
    K = 8  # num_keypoints
    k1, k2, k3, k4, k5 = jax.random.split(key, 5)
    x = jax.random.normal(k1, (N, Cin, H, W), jnp.float32)
    fan_out = Cin * 4 * 4
    std = float(np.sqrt(2.0 / fan_out))
    weight = std * jax.random.normal(k2, (Cin, K, 4, 4), jnp.float32)
    bias = jnp.zeros((K,), jnp.float32)

    out = keypoint_rcnn_predictor(x, weight, bias)
    out = jax.block_until_ready(out)
    assert out.shape == (N, K, 4 * H, 4 * W), out.shape
    ref = _ref_forward(x, weight, bias)
    np.testing.assert_allclose(np.asarray(out), ref, rtol=1e-4, atol=1e-4)

    # ---- test 2: exercises K padding (K < Kp), H != W, odd W, nonzero bias ----
    N2, C2, H2, W2, K2 = 3, 3, 7, 5, 5
    x2 = jax.random.normal(k3, (N2, C2, H2, W2), jnp.float32)
    w2 = 0.3 * jax.random.normal(k4, (C2, K2, 4, 4), jnp.float32)
    b2 = 0.1 * jax.random.normal(k5, (K2,), jnp.float32)
    out2 = keypoint_rcnn_predictor(x2, w2, b2)
    out2 = jax.block_until_ready(out2)
    assert out2.shape == (N2, K2, 4 * H2, 4 * W2), out2.shape
    ref2 = _ref_forward(x2, w2, b2)
    np.testing.assert_allclose(np.asarray(out2), ref2, rtol=1e-4, atol=1e-4)

    print("KERNEL_OK")
</pallas_src>

<mosaic_0001>
module attributes {stable_mosaic.version = 11 : i64} {
  func.func @kernel(%arg0: i32, %arg1: memref<1x4x256xf32, #tpu.memory_space<vmem>>, %arg2: memref<128x4xf32, #tpu.memory_space<vmem>>, %arg3: memref<8x1xf32, #tpu.memory_space<vmem>>, %arg4: memref<4x256xf32, #tpu.memory_space<vmem>>, %arg5: memref<1x4x4x8x256xf32, #tpu.memory_space<vmem>>, %arg6: memref<128x290xf32, #tpu.memory_space<vmem>>, %arg7: memref<32x290xf32, #tpu.memory_space<vmem>>, %arg8: memref<64x290xf32, #tpu.memory_space<vmem>>) attributes {dimension_semantics = [#tpu.dimension_semantics<parallel>], iteration_bounds = array<i64: 2>, scalar_prefetch = 0 : i64, scratch_operands = 3 : i64, tpu.core_type = #tpu.core_type<tc>, window_params = [{transform_indices = @transform_0, window_bounds = array<i64: 1, 4, 256>}, {pipeline_mode = #tpu.pipeline_mode<synchronous>, transform_indices = @transform_1, window_bounds = array<i64: 128, 4>}, {pipeline_mode = #tpu.pipeline_mode<synchronous>, transform_indices = @transform_2, window_bounds = array<i64: 8, 1>}, {pipeline_mode = #tpu.pipeline_mode<synchronous>, transform_indices = @transform_3, window_bounds = array<i64: 4, 256>}, {transform_indices = @transform_4, window_bounds = array<i64: 1, 4, 4, 8, 256>}]} {
    %cst = arith.constant 0.000000e+00 : f32
    %0 = vector.broadcast %cst : f32 to vector<128x290xf32>
    %c0 = arith.constant 0 : index
    %c0_0 = arith.constant 0 : index
    %1 = vector.load %arg6[%c0, %c0_0] : memref<128x290xf32, #tpu.memory_space<vmem>>, vector<128x290xf32>
    tpu.vector_store %arg6[%c0, %c0_0], %0 {strides = array<i32>} : memref<128x290xf32, #tpu.memory_space<vmem>>, vector<128x290xf32>,
    %cst_1 = arith.constant 0.000000e+00 : f32
    %2 = vector.broadcast %cst_1 : f32 to vector<32x290xf32>
    %c0_2 = arith.constant 0 : index
    %c0_3 = arith.constant 0 : index
    %3 = vector.load %arg7[%c0_2, %c0_3] : memref<32x290xf32, #tpu.memory_space<vmem>>, vector<32x290xf32>
    tpu.vector_store %arg7[%c0_2, %c0_3], %2 {strides = array<i32>} : memref<32x290xf32, #tpu.memory_space<vmem>>, vector<32x290xf32>,
    %cst_4 = arith.constant 0.000000e+00 : f32
    %4 = vector.broadcast %cst_4 : f32 to vector<64x290xf32>
    %c0_5 = arith.constant 0 : index
    %c0_6 = arith.constant 0 : index
    %5 = vector.load %arg8[%c0_5, %c0_6] : memref<64x290xf32, #tpu.memory_space<vmem>>, vector<64x290xf32>
    tpu.vector_store %arg8[%c0_5, %c0_6], %4 {strides = array<i32>} : memref<64x290xf32, #tpu.memory_space<vmem>>, vector<64x290xf32>,
    %c0_7 = arith.constant 0 : index
    %c0_8 = arith.constant 0 : index
    %6 = vector.load %arg4[%c0_7, %c0_8] : memref<4x256xf32, #tpu.memory_space<vmem>>, vector<1x256xf32>
    %c1 = arith.constant 1 : index
    %c0_9 = arith.constant 0 : index
    %7 = vector.load %arg4[%c1, %c0_9] : memref<4x256xf32, #tpu.memory_space<vmem>>, vector<1x256xf32>
    %c2 = arith.constant 2 : index
    %c0_10 = arith.constant 0 : index
    %8 = vector.load %arg4[%c2, %c0_10] : memref<4x256xf32, #tpu.memory_space<vmem>>, vector<1x256xf32>
    %c3 = arith.constant 3 : index
    %c0_11 = arith.constant 0 : index
    %9 = vector.load %arg4[%c3, %c0_11] : memref<4x256xf32, #tpu.memory_space<vmem>>, vector<1x256xf32>
    %cst_12 = arith.constant 1.000000e+00 : f32
    %10 = vector.broadcast %cst_12 : f32 to vector<1x256xf32>
    %11 = arith.subf %10, %8 : vector<1x256xf32>
    %cst_13 = arith.constant 1.000000e+00 : f32
    %12 = vector.broadcast %cst_13 : f32 to vector<1x256xf32>
    %13 = arith.subf %12, %9 : vector<1x256xf32>
    %c0_14 = arith.constant 0 : index
    %c0_15 = arith.constant 0 : index
    %14 = vector.load %arg3[%c0_14, %c0_15] : memref<8x1xf32, #tpu.memory_space<vmem>>, vector<8x1xf32>
    %c0_16 = arith.constant 0 : index
    %c0_17 = arith.constant 0 : index
    %c0_18 = arith.constant 0 : index
    %15 = vector.load %arg1[%c0_16, %c0_17, %c0_18] : memref<1x4x256xf32, #tpu.memory_space<vmem>>, vector<1x4x256xf32>
    %16 = vector.shape_cast %15 : vector<1x4x256xf32> to vector<4x256xf32>
    %c0_19 = arith.constant 0 : index
    %c0_20 = arith.constant 0 : index
    %17 = vector.load %arg2[%c0_19, %c0_20] : memref<128x4xf32, #tpu.memory_space<vmem>>, vector<128x4xf32>
    %cst_21 = arith.constant dense<0.000000e+00> : vector<128x256xf32>
    %18 = tpu.matmul %17, %16, %cst_21 {dimension_numbers = #tpu.dot_dimension_numbers<[1], [0], [0], [1], [0, 0, 1, 1], [], []>} : vector<128x4xf32>, vector<4x256xf32>, vector<128x256xf32> -> vector<128x256xf32>
    %c0_22 = arith.constant 0 : index
    %c17 = arith.constant 17 : index
    %19 = vector.load %arg6[%c0_22, %c17] : memref<128x290xf32, #tpu.memory_space<vmem>>, vector<128x256xf32>
    tpu.vector_store %arg6[%c0_22, %c17], %18 {strides = array<i32>} : memref<128x290xf32, #tpu.memory_space<vmem>>, vector<128x256xf32>,
    %c40 = arith.constant 40 : index
    %c17_23 = arith.constant 17 : index
    %20 = vector.load %arg6[%c40, %c17_23] : memref<128x290xf32, #tpu.memory_space<vmem>>, vector<8x256xf32>
    %c56 = arith.constant 56 : index
    %c16 = arith.constant 16 : index
    %21 = vector.load %arg6[%c56, %c16] : memref<128x290xf32, #tpu.memory_space<vmem>>, vector<8x256xf32>
    %22 = vector.broadcast %11 : vector<1x256xf32> to vector<8x256xf32>
    %23 = arith.mulf %21, %22 : vector<8x256xf32>
    %24 = arith.addf %20, %23 : vector<8x256xf32>
    %c104 = arith.constant 104 : index
    %c1_24 = arith.constant 1 : index
    %25 = vector.load %arg6[%c104, %c1_24] : memref<128x290xf32, #tpu.memory_space<vmem>>, vector<8x256xf32>
    %26 = arith.addf %24, %25 : vector<8x256xf32>
    %c120 = arith.constant 120 : index
    %c0_25 = arith.constant 0 : index
    %27 = vector.load %arg6[%c120, %c0_25] : memref<128x290xf32, #tpu.memory_space<vmem>>, vector<8x256xf32>
    %28 = vector.broadcast %11 : vector<1x256xf32> to vector<8x256xf32>
    %29 = arith.mulf %27, %28 : vector<8x256xf32>
    %30 = arith.addf %26, %29 : vector<8x256xf32>
    %31 = vector.broadcast %14 : vector<8x1xf32> to vector<8x256xf32>
    %32 = arith.addf %30, %31 : vector<8x256xf32>
    %c0_26 = arith.constant 0 : index
    %c17_27 = arith.constant 17 : index
    %33 = vector.load %arg7[%c0_26, %c17_27] : memref<32x290xf32, #tpu.memory_space<vmem>>, vector<8x256xf32>
    tpu.vector_store %arg7[%c0_26, %c17_27], %32 {strides = array<i32>} : memref<32x290xf32, #tpu.memory_space<vmem>>, vector<8x256xf32>,
    %c48 = arith.constant 48 : index
    %c17_28 = arith.constant 17 : index
    %34 = vector.load %arg6[%c48, %c17_28] : memref<128x290xf32, #tpu.memory_space<vmem>>, vector<8x256xf32>
    %c32 = arith.constant 32 : index
    %c18 = arith.constant 18 : index
    %35 = vector.load %arg6[%c32, %c18] : memref<128x290xf32, #tpu.memory_space<vmem>>, vector<8x256xf32>
    %36 = vector.broadcast %13 : vector<1x256xf32> to vector<8x256xf32>
    %37 = arith.mulf %35, %36 : vector<8x256xf32>
    %38 = arith.addf %34, %37 : vector<8x256xf32>
    %c112 = arith.constant 112 : index
    %c1_29 = arith.constant 1 : index
    %39 = vector.load %arg6[%c112, %c1_29] : memref<128x290xf32, #tpu.memory_space<vmem>>, vector<8x256xf32>
    %40 = arith.addf %38, %39 : vector<8x256xf32>
    %c96 = arith.constant 96 : index
    %c2_30 = arith.constant 2 : index
    %41 = vector.load %arg6[%c96, %c2_30] : memref<128x290xf32, #tpu.memory_space<vmem>>, vector<8x256xf32>
    %42 = vector.broadcast %13 : vector<1x256xf32> to vector<8x256xf32>
    %43 = arith.mulf %41, %42 : vector<8x256xf32>
    %44 = arith.addf %40, %43 : vector<8x256xf32>
    %45 = vector.broadcast %14 : vector<8x1xf32> to vector<8x256xf32>
    %46 = arith.addf %44, %45 : vector<8x256xf32>
    %c8 = arith.constant 8 : index
    %c17_31 = arith.constant 17 : index
    %47 = vector.load %arg7[%c8, %c17_31] : memref<32x290xf32, #tpu.memory_space<vmem>>, vector<8x256xf32>
    tpu.vector_store %arg7[%c8, %c17_31], %46 {strides = array<i32>} : memref<32x290xf32, #tpu.memory_space<vmem>>, vector<8x256xf32>,
    %c72 = arith.constant 72 : index
    %c17_32 = arith.constant 17 : index
    %48 = vector.load %arg6[%c72, %c17_32] : memref<128x290xf32, #tpu.memory_space<vmem>>, vector<8x256xf32>
    %c88 = arith.constant 88 : index
    %c16_33 = arith.constant 16 : index
    %49 = vector.load %arg6[%c88, %c16_33] : memref<128x290xf32, #tpu.memory_space<vmem>>, vector<8x256xf32>
    %50 = vector.broadcast %11 : vector<1x256xf32> to vector<8x256xf32>
    %51 = arith.mulf %49, %50 : vector<8x256xf32>
    %52 = arith.addf %48, %51 : vector<8x256xf32>
    %c8_34 = arith.constant 8 : index
    %c33 = arith.constant 33 : index
    %53 = vector.load %arg6[%c8_34, %c33] : memref<128x290xf32, #tpu.memory_space<vmem>>, vector<8x256xf32>
    %54 = arith.addf %52, %53 : vector<8x256xf32>
    %c24 = arith.constant 24 : index
    %c32_35 = arith.constant 32 : index
    %55 = vector.load %arg6[%c24, %c32_35] : memref<128x290xf32, #tpu.memory_space<vmem>>, vector<8x256xf32>
    %56 = vector.broadcast %11 : vector<1x256xf32> to vector<8x256xf32>
    %57 = arith.mulf %55, %56 : vector<8x256xf32>
    %58 = arith.addf %54, %57 : vector<8x256xf32>
    %59 = vector.broadcast %14 : vector<8x1xf32> to vector<8x256xf32>
    %60 = arith.addf %58, %59 : vector<8x256xf32>
    %c16_36 = arith.constant 16 : index
    %c17_37 = arith.constant 17 : index
    %61 = vector.load %arg7[%c16_36, %c17_37] : memref<32x290xf32, #tpu.memory_space<vmem>>, vector<8x256xf32>
    tpu.vector_store %arg7[%c16_36, %c17_37], %60 {strides = array<i32>} : memref<32x290xf32, #tpu.memory_space<vmem>>, vector<8x256xf32>,
    %c80 = arith.constant 80 : index
    %c17_38 = arith.constant 17 : index
    %62 = vector.load %arg6[%c80, %c17_38] : memref<128x290xf32, #tpu.memory_space<vmem>>, vector<8x256xf32>
    %c64 = arith.constant 64 : index
    %c18_39 = arith.constant 18 : index
    %63 = vector.load %arg6[%c64, %c18_39] : memref<128x290xf32, #tpu.memory_space<vmem>>, vector<8x256xf32>
    %64 = vector.broadcast %13 : vector<1x256xf32> to vector<8x256xf32>
    %65 = arith.mulf %63, %64 : vector<8x256xf32>
    %66 = arith.addf %62, %65 : vector<8x256xf32>
    %c16_40 = arith.constant 16 : index
    %c33_41 = arith.constant 33 : index
    %67 = vector.load %arg6[%c16_40, %c33_41] : memref<128x290xf32, #tpu.memory_space<vmem>>, vector<8x256xf32>
    %68 = arith.addf %66, %67 : vector<8x256xf32>
    %c0_42 = arith.constant 0 : index
    %c34 = arith.constant 34 : index
    %69 = vector.load %arg6[%c0_42, %c34] : memref<128x290xf32, #tpu.memory_space<vmem>>, vector<8x256xf32>
    %70 = vector.broadcast %13 : vector<1x256xf32> to vector<8x256xf32>
    %71 = arith.mulf %69, %70 : vector<8x256xf32>
    %72 = arith.addf %68, %71 : vector<8x256xf32>
    %73 = vector.broadcast %14 : vector<8x1xf32> to vector<8x256xf32>
    %74 = arith.addf %72, %73 : vector<8x256xf32>
    %c24_43 = arith.constant 24 : index
    %c17_44 = arith.constant 17 : index
    %75 = vector.load %arg7[%c24_43, %c17_44] : memref<32x290xf32, #tpu.memory_space<vmem>>, vector<8x256xf32>
    tpu.vector_store %arg7[%c24_43, %c17_44], %74 {strides = array<i32>} : memref<32x290xf32, #tpu.memory_space<vmem>>, vector<8x256xf32>,
    %c0_45 = arith.constant 0 : index
    %c17_46 = arith.constant 17 : index
    %76 = vector.load %arg7[%c0_45, %c17_46] : memref<32x290xf32, #tpu.memory_space<vmem>>, vector<8x256xf32>
    %c16_47 = arith.constant 16 : index
    %c17_48 = arith.constant 17 : index
    %77 = vector.load %arg7[%c16_47, %c17_48] : memref<32x290xf32, #tpu.memory_space<vmem>>, vector<8x256xf32>
    %c16_49 = arith.constant 16 : index
    %c1_50 = arith.constant 1 : index
    %78 = vector.load %arg7[%c16_49, %c1_50] : memref<32x290xf32, #tpu.memory_space<vmem>>, vector<8x256xf32>
    %c0_51 = arith.constant 0 : index
    %c33_52 = arith.constant 33 : index
    %79 = vector.load %arg7[%c0_51, %c33_52] : memref<32x290xf32, #tpu.memory_space<vmem>>, vector<8x256xf32>
    %cst_53 = arith.constant 7.500000e-01 : f32
    %80 = vector.broadcast %cst_53 : f32 to vector<8x256xf32>
    %81 = arith.mulf %80, %76 : vector<8x256xf32>
    %82 = vector.broadcast %6 : vector<1x256xf32> to vector<8x256xf32>
    %83 = arith.mulf %82, %76 : vector<8x256xf32>
    %84 = arith.addf %78, %83 : vector<8x256xf32>
    %cst_54 = arith.constant 2.500000e-01 : f32
    %85 = vector.broadcast %cst_54 : f32 to vector<8x256xf32>
    %86 = arith.mulf %85, %84 : vector<8x256xf32>
    %87 = arith.addf %81, %86 : vector<8x256xf32>
    %cst_55 = arith.constant 7.500000e-01 : f32
    %88 = vector.broadcast %cst_55 : f32 to vector<8x256xf32>
    %89 = arith.mulf %88, %76 : vector<8x256xf32>
    %cst_56 = arith.constant 2.500000e-01 : f32
    %90 = vector.broadcast %cst_56 : f32 to vector<8x256xf32>
    %91 = arith.mulf %90, %77 : vector<8x256xf32>
    %92 = arith.addf %89, %91 : vector<8x256xf32>
    %cst_57 = arith.constant 2.500000e-01 : f32
    %93 = vector.broadcast %cst_57 : f32 to vector<8x256xf32>
    %94 = arith.mulf %93, %76 : vector<8x256xf32>
    %cst_58 = arith.constant 7.500000e-01 : f32
    %95 = vector.broadcast %cst_58 : f32 to vector<8x256xf32>
    %96 = arith.mulf %95, %77 : vector<8x256xf32>
    %97 = arith.addf %94, %96 : vector<8x256xf32>
    %cst_59 = arith.constant 7.500000e-01 : f32
    %98 = vector.broadcast %cst_59 : f32 to vector<8x256xf32>
    %99 = arith.mulf %98, %77 : vector<8x256xf32>
    %100 = vector.broadcast %7 : vector<1x256xf32> to vector<8x256xf32>
    %101 = arith.mulf %100, %77 : vector<8x256xf32>
    %102 = arith.addf %79, %101 : vector<8x256xf32>
    %cst_60 = arith.constant 2.500000e-01 : f32
    %103 = vector.broadcast %cst_60 : f32 to vector<8x256xf32>
    %104 = arith.mulf %103, %102 : vector<8x256xf32>
    %105 = arith.addf %99, %104 : vector<8x256xf32>
    %c0_61 = arith.constant 0 : index
    %c17_62 = arith.constant 17 : index
    %106 = vector.load %arg8[%c0_61, %c17_62] : memref<64x290xf32, #tpu.memory_space<vmem>>, vector<8x256xf32>
    tpu.vector_store %arg8[%c0_61, %c17_62], %87 {strides = array<i32>} : memref<64x290xf32, #tpu.memory_space<vmem>>, vector<8x256xf32>,
    %c16_63 = arith.constant 16 : index
    %c17_64 = arith.constant 17 : index
    %107 = vector.load %arg8[%c16_63, %c17_64] : memref<64x290xf32, #tpu.memory_space<vmem>>, vector<8x256xf32>
    tpu.vector_store %arg8[%c16_63, %c17_64], %92 {strides = array<i32>} : memref<64x290xf32, #tpu.memory_space<vmem>>, vector<8x256xf32>,
    %c32_65 = arith.constant 32 : index
    %c17_66 = arith.constant 17 : index
    %108 = vector.load %arg8[%c32_65, %c17_66] : memref<64x290xf32, #tpu.memory_space<vmem>>, vector<8x256xf32>
    tpu.vector_store %arg8[%c32_65, %c17_66], %97 {strides = array<i32>} : memref<64x290xf32, #tpu.memory_space<vmem>>, vector<8x256xf32>,
    %c48_67 = arith.constant 48 : index
    %c17_68 = arith.constant 17 : index
    %109 = vector.load %arg8[%c48_67, %c17_68] : memref<64x290xf32, #tpu.memory_space<vmem>>, vector<8x256xf32>
    tpu.vector_store %arg8[%c48_67, %c17_68], %105 {strides = array<i32>} : memref<64x290xf32, #tpu.memory_space<vmem>>, vector<8x256xf32>,
    %c8_69 = arith.constant 8 : index
    %c17_70 = arith.constant 17 : index
    %110 = vector.load %arg7[%c8_69, %c17_70] : memref<32x290xf32, #tpu.memory_space<vmem>>, vector<8x256xf32>
    %c24_71 = arith.constant 24 : index
    %c17_72 = arith.constant 17 : index
    %111 = vector.load %arg7[%c24_71, %c17_72] : memref<32x290xf32, #tpu.memory_space<vmem>>, vector<8x256xf32>
    %c24_73 = arith.constant 24 : index
    %c1_74 = arith.constant 1 : index
    %112 = vector.load %arg7[%c24_73, %c1_74] : memref<32x290xf32, #tpu.memory_space<vmem>>, vector<8x256xf32>
    %c8_75 = arith.constant 8 : index
    %c33_76 = arith.constant 33 : index
    %113 = vector.load %arg7[%c8_75, %c33_76] : memref<32x290xf32, #tpu.memory_space<vmem>>, vector<8x256xf32>
    %cst_77 = arith.constant 7.500000e-01 : f32
    %114 = vector.broadcast %cst_77 : f32 to vector<8x256xf32>
    %115 = arith.mulf %114, %110 : vector<8x256xf32>
    %116 = vector.broadcast %6 : vector<1x256xf32> to vector<8x256xf32>
    %117 = arith.mulf %116, %110 : vector<8x256xf32>
    %118 = arith.addf %112, %117 : vector<8x256xf32>
    %cst_78 = arith.constant 2.500000e-01 : f32
    %119 = vector.broadcast %cst_78 : f32 to vector<8x256xf32>
    %120 = arith.mulf %119, %118 : vector<8x256xf32>
    %121 = arith.addf %115, %120 : vector<8x256xf32>
    %cst_79 = arith.constant 7.500000e-01 : f32
    %122 = vector.broadcast %cst_79 : f32 to vector<8x256xf32>
    %123 = arith.mulf %122, %110 : vector<8x256xf32>
    %cst_80 = arith.constant 2.500000e-01 : f32
    %124 = vector.broadcast %cst_80 : f32 to vector<8x256xf32>
    %125 = arith.mulf %124, %111 : vector<8x256xf32>
    %126 = arith.addf %123, %125 : vector<8x256xf32>
    %cst_81 = arith.constant 2.500000e-01 : f32
    %127 = vector.broadcast %cst_81 : f32 to vector<8x256xf32>
    %128 = arith.mulf %127, %110 : vector<8x256xf32>
    %cst_82 = arith.constant 7.500000e-01 : f32
    %129 = vector.broadcast %cst_82 : f32 to vector<8x256xf32>
    %130 = arith.mulf %129, %111 : vector<8x256xf32>
    %131 = arith.addf %128, %130 : vector<8x256xf32>
    %cst_83 = arith.constant 7.500000e-01 : f32
    %132 = vector.broadcast %cst_83 : f32 to vector<8x256xf32>
    %133 = arith.mulf %132, %111 : vector<8x256xf32>
    %134 = vector.broadcast %7 : vector<1x256xf32> to vector<8x256xf32>
    %135 = arith.mulf %134, %111 : vector<8x256xf32>
    %136 = arith.addf %113, %135 : vector<8x256xf32>
    %cst_84 = arith.constant 2.500000e-01 : f32
    %137 = vector.broadcast %cst_84 : f32 to vector<8x256xf32>
    %138 = arith.mulf %137, %136 : vector<8x256xf32>
    %139 = arith.addf %133, %138 : vector<8x256xf32>
    %c8_85 = arith.constant 8 : index
    %c17_86 = arith.constant 17 : index
    %140 = vector.load %arg8[%c8_85, %c17_86] : memref<64x290xf32, #tpu.memory_space<vmem>>, vector<8x256xf32>
    tpu.vector_store %arg8[%c8_85, %c17_86], %121 {strides = array<i32>} : memref<64x290xf32, #tpu.memory_space<vmem>>, vector<8x256xf32>,
    %c24_87 = arith.constant 24 : index
    %c17_88 = arith.constant 17 : index
    %141 = vector.load %arg8[%c24_87, %c17_88] : memref<64x290xf32, #tpu.memory_space<vmem>>, vector<8x256xf32>
    tpu.vector_store %arg8[%c24_87, %c17_88], %126 {strides = array<i32>} : memref<64x290xf32, #tpu.memory_space<vmem>>, vector<8x256xf32>,
    %c40_89 = arith.constant 40 : index
    %c17_90 = arith.constant 17 : index
    %142 = vector.load %arg8[%c40_89, %c17_90] : memref<64x290xf32, #tpu.memory_space<vmem>>, vector<8x256xf32>
    tpu.vector_store %arg8[%c40_89, %c17_90], %131 {strides = array<i32>} : memref<64x290xf32, #tpu.memory_space<vmem>>, vector<8x256xf32>,
    %c56_91 = arith.constant 56 : index
    %c17_92 = arith.constant 17 : index
    %143 = vector.load %arg8[%c56_91, %c17_92] : memref<64x290xf32, #tpu.memory_space<vmem>>, vector<8x256xf32>
    tpu.vector_store %arg8[%c56_91, %c17_92], %139 {strides = array<i32>} : memref<64x290xf32, #tpu.memory_space<vmem>>, vector<8x256xf32>,
    %c0_93 = arith.constant 0 : index
    %c17_94 = arith.constant 17 : index
    %144 = vector.load %arg8[%c0_93, %c17_94] : memref<64x290xf32, #tpu.memory_space<vmem>>, vector<8x256xf32>
    %c8_95 = arith.constant 8 : index
    %c17_96 = arith.constant 17 : index
    %145 = vector.load %arg8[%c8_95, %c17_96] : memref<64x290xf32, #tpu.memory_space<vmem>>, vector<8x256xf32>
    %c8_97 = arith.constant 8 : index
    %c16_98 = arith.constant 16 : index
    %146 = vector.load %arg8[%c8_97, %c16_98] : memref<64x290xf32, #tpu.memory_space<vmem>>, vector<8x256xf32>
    %147 = vector.broadcast %11 : vector<1x256xf32> to vector<8x256xf32>
    %148 = arith.mulf %146, %147 : vector<8x256xf32>
    %c0_99 = arith.constant 0 : index
    %c18_100 = arith.constant 18 : index
    %149 = vector.load %arg8[%c0_99, %c18_100] : memref<64x290xf32, #tpu.memory_space<vmem>>, vector<8x256xf32>
    %150 = vector.broadcast %13 : vector<1x256xf32> to vector<8x256xf32>
    %151 = arith.mulf %149, %150 : vector<8x256xf32>
    %cst_101 = arith.constant 7.500000e-01 : f32
    %152 = vector.broadcast %cst_101 : f32 to vector<8x256xf32>
    %153 = arith.mulf %152, %144 : vector<8x256xf32>
    %154 = vector.broadcast %8 : vector<1x256xf32> to vector<8x256xf32>
    %155 = arith.mulf %154, %144 : vector<8x256xf32>
    %156 = arith.addf %148, %155 : vector<8x256xf32>
    %cst_102 = arith.constant 2.500000e-01 : f32
    %157 = vector.broadcast %cst_102 : f32 to vector<8x256xf32>
    %158 = arith.mulf %157, %156 : vector<8x256xf32>
    %159 = arith.addf %153, %158 : vector<8x256xf32>
    %cst_103 = arith.constant 7.500000e-01 : f32
    %160 = vector.broadcast %cst_103 : f32 to vector<8x256xf32>
    %161 = arith.mulf %160, %144 : vector<8x256xf32>
    %cst_104 = arith.constant 2.500000e-01 : f32
    %162 = vector.broadcast %cst_104 : f32 to vector<8x256xf32>
    %163 = arith.mulf %162, %145 : vector<8x256xf32>
    %164 = arith.addf %161, %163 : vector<8x256xf32>
    %cst_105 = arith.constant 2.500000e-01 : f32
    %165 = vector.broadcast %cst_105 : f32 to vector<8x256xf32>
    %166 = arith.mulf %165, %144 : vector<8x256xf32>
    %cst_106 = arith.constant 7.500000e-01 : f32
    %167 = vector.broadcast %cst_106 : f32 to vector<8x256xf32>
    %168 = arith.mulf %167, %145 : vector<8x256xf32>
    %169 = arith.addf %166, %168 : vector<8x256xf32>
    %cst_107 = arith.constant 7.500000e-01 : f32
    %170 = vector.broadcast %cst_107 : f32 to vector<8x256xf32>
    %171 = arith.mulf %170, %145 : vector<8x256xf32>
    %172 = vector.broadcast %9 : vector<1x256xf32> to vector<8x256xf32>
    %173 = arith.mulf %172, %145 : vector<8x256xf32>
    %174 = arith.addf %151, %173 : vector<8x256xf32>
    %cst_108 = arith.constant 2.500000e-01 : f32
    %175 = vector.broadcast %cst_108 : f32 to vector<8x256xf32>
    %176 = arith.mulf %175, %174 : vector<8x256xf32>
    %177 = arith.addf %171, %176 : vector<8x256xf32>
    %c0_109 = arith.constant 0 : index
    %c0_110 = arith.constant 0 : index
    %c0_111 = arith.constant 0 : index
    %c0_112 = arith.constant 0 : index
    %c0_113 = arith.constant 0 : index
    %178 = vector.load %arg5[%c0_109, %c0_110, %c0_111, %c0_112, %c0_113] : memref<1x4x4x8x256xf32, #tpu.memory_space<vmem>>, vector<1x1x1x8x256xf32>
    %179 = vector.shape_cast %178 : vector<1x1x1x8x256xf32> to vector<8x256xf32>
    %180 = vector.shape_cast %159 : vector<8x256xf32> to vector<1x1x1x8x256xf32>
    tpu.vector_store %arg5[%c0_109, %c0_110, %c0_111, %c0_112, %c0_113], %180 {strides = array<i32>} : memref<1x4x4x8x256xf32, #tpu.memory_space<vmem>>, vector<1x1x1x8x256xf32>,
    %c0_114 = arith.constant 0 : index
    %c0_115 = arith.constant 0 : index
    %c1_116 = arith.constant 1 : index
    %c0_117 = arith.constant 0 : index
    %c0_118 = arith.constant 0 : index
    %181 = vector.load %arg5[%c0_114, %c0_115, %c1_116, %c0_117, %c0_118] : memref<1x4x4x8x256xf32, #tpu.memory_space<vmem>>, vector<1x1x1x8x256xf32>
    %182 = vector.shape_cast %181 : vector<1x1x1x8x256xf32> to vector<8x256xf32>
    %183 = vector.shape_cast %164 : vector<8x256xf32> to vector<1x1x1x8x256xf32>
    tpu.vector_store %arg5[%c0_114, %c0_115, %c1_116, %c0_117, %c0_118], %183 {strides = array<i32>} : memref<1x4x4x8x256xf32, #tpu.memory_space<vmem>>, vector<1x1x1x8x256xf32>,
    %c0_119 = arith.constant 0 : index
    %c0_120 = arith.constant 0 : index
    %c2_121 = arith.constant 2 : index
    %c0_122 = arith.constant 0 : index
    %c0_123 = arith.constant 0 : index
    %184 = vector.load %arg5[%c0_119, %c0_120, %c2_121, %c0_122, %c0_123] : memref<1x4x4x8x256xf32, #tpu.memory_space<vmem>>, vector<1x1x1x8x256xf32>
    %185 = vector.shape_cast %184 : vector<1x1x1x8x256xf32> to vector<8x256xf32>
    %186 = vector.shape_cast %169 : vector<8x256xf32> to vector<1x1x1x8x256xf32>
    tpu.vector_store %arg5[%c0_119, %c0_120, %c2_121, %c0_122, %c0_123], %186 {strides = array<i32>} : memref<1x4x4x8x256xf32, #tpu.memory_space<vmem>>, vector<1x1x1x8x256xf32>,
    %c0_124 = arith.constant 0 : index
    %c0_125 = arith.constant 0 : index
    %c3_126 = arith.constant 3 : index
    %c0_127 = arith.constant 0 : index
    %c0_128 = arith.constant 0 : index
    %187 = vector.load %arg5[%c0_124, %c0_125, %c3_126, %c0_127, %c0_128] : memref<1x4x4x8x256xf32, #tpu.memory_space<vmem>>, vector<1x1x1x8x256xf32>
    %188 = vector.shape_cast %187 : vector<1x1x1x8x256xf32> to vector<8x256xf32>
    %189 = vector.shape_cast %177 : vector<8x256xf32> to vector<1x1x1x8x256xf32>
    tpu.vector_store %arg5[%c0_124, %c0_125, %c3_126, %c0_127, %c0_128], %189 {strides = array<i32>} : memref<1x4x4x8x256xf32, #tpu.memory_space<vmem>>, vector<1x1x1x8x256xf32>,
    %c16_129 = arith.constant 16 : index
    %c17_130 = arith.constant 17 : index
    %190 = vector.load %arg8[%c16_129, %c17_130] : memref<64x290xf32, #tpu.memory_space<vmem>>, vector<8x256xf32>
    %c24_131 = arith.constant 24 : index
    %c17_132 = arith.constant 17 : index
    %191 = vector.load %arg8[%c24_131, %c17_132] : memref<64x290xf32, #tpu.memory_space<vmem>>, vector<8x256xf32>
    %c24_133 = arith.constant 24 : index
    %c16_134 = arith.constant 16 : index
    %192 = vector.load %arg8[%c24_133, %c16_134] : memref<64x290xf32, #tpu.memory_space<vmem>>, vector<8x256xf32>
    %193 = vector.broadcast %11 : vector<1x256xf32> to vector<8x256xf32>
    %194 = arith.mulf %192, %193 : vector<8x256xf32>
    %c16_135 = arith.constant 16 : index
    %c18_136 = arith.constant 18 : index
    %195 = vector.load %arg8[%c16_135, %c18_136] : memref<64x290xf32, #tpu.memory_space<vmem>>, vector<8x256xf32>
    %196 = vector.broadcast %13 : vector<1x256xf32> to vector<8x256xf32>
    %197 = arith.mulf %195, %196 : vector<8x256xf32>
    %cst_137 = arith.constant 7.500000e-01 : f32
    %198 = vector.broadcast %cst_137 : f32 to vector<8x256xf32>
    %199 = arith.mulf %198, %190 : vector<8x256xf32>
    %200 = vector.broadcast %8 : vector<1x256xf32> to vector<8x256xf32>
    %201 = arith.mulf %200, %190 : vector<8x256xf32>
    %202 = arith.addf %194, %201 : vector<8x256xf32>
    %cst_138 = arith.constant 2.500000e-01 : f32
    %203 = vector.broadcast %cst_138 : f32 to vector<8x256xf32>
    %204 = arith.mulf %203, %202 : vector<8x256xf32>
    %205 = arith.addf %199, %204 : vector<8x256xf32>
    %cst_139 = arith.constant 7.500000e-01 : f32
    %206 = vector.broadcast %cst_139 : f32 to vector<8x256xf32>
    %207 = arith.mulf %206, %190 : vector<8x256xf32>
    %cst_140 = arith.constant 2.500000e-01 : f32
    %208 = vector.broadcast %cst_140 : f32 to vector<8x256xf32>
    %209 = arith.mulf %208, %191 : vector<8x256xf32>
    %210 = arith.addf %207, %209 : vector<8x256xf32>
    %cst_141 = arith.constant 2.500000e-01 : f32
    %211 = vector.broadcast %cst_141 : f32 to vector<8x256xf32>
    %212 = arith.mulf %211, %190 : vector<8x256xf32>
    %cst_142 = arith.constant 7.500000e-01 : f32
    %213 = vector.broadcast %cst_142 : f32 to vector<8x256xf32>
    %214 = arith.mulf %213, %191 : vector<8x256xf32>
    %215 = arith.addf %212, %214 : vector<8x256xf32>
    %cst_143 = arith.constant 7.500000e-01 : f32
    %216 = vector.broadcast %cst_143 : f32 to vector<8x256xf32>
    %217 = arith.mulf %216, %191 : vector<8x256xf32>
    %218 = vector.broadcast %9 : vector<1x256xf32> to vector<8x256xf32>
    %219 = arith.mulf %218, %191 : vector<8x256xf32>
    %220 = arith.addf %197, %219 : vector<8x256xf32>
    %cst_144 = arith.constant 2.500000e-01 : f32
    %221 = vector.broadcast %cst_144 : f32 to vector<8x256xf32>
    %222 = arith.mulf %221, %220 : vector<8x256xf32>
    %223 = arith.addf %217, %222 : vector<8x256xf32>
    %c0_145 = arith.constant 0 : index
    %c1_146 = arith.constant 1 : index
    %c0_147 = arith.constant 0 : index
    %c0_148 = arith.constant 0 : index
    %c0_149 = arith.constant 0 : index
    %224 = vector.load %arg5[%c0_145, %c1_146, %c0_147, %c0_148, %c0_149] : memref<1x4x4x8x256xf32, #tpu.memory_space<vmem>>, vector<1x1x1x8x256xf32>
    %225 = vector.shape_cast %224 : vector<1x1x1x8x256xf32> to vector<8x256xf32>
    %226 = vector.shape_cast %205 : vector<8x256xf32> to vector<1x1x1x8x256xf32>
    tpu.vector_store %arg5[%c0_145, %c1_146, %c0_147, %c0_148, %c0_149], %226 {strides = array<i32>} : memref<1x4x4x8x256xf32, #tpu.memory_space<vmem>>, vector<1x1x1x8x256xf32>,
    %c0_150 = arith.constant 0 : index
    %c1_151 = arith.constant 1 : index
    %c1_152 = arith.constant 1 : index
    %c0_153 = arith.constant 0 : index
    %c0_154 = arith.constant 0 : index
    %227 = vector.load %arg5[%c0_150, %c1_151, %c1_152, %c0_153, %c0_154] : memref<1x4x4x8x256xf32, #tpu.memory_space<vmem>>, vector<1x1x1x8x256xf32>
    %228 = vector.shape_cast %227 : vector<1x1x1x8x256xf32> to vector<8x256xf32>
    %229 = vector.shape_cast %210 : vector<8x256xf32> to vector<1x1x1x8x256xf32>
    tpu.vector_store %arg5[%c0_150, %c1_151, %c1_152, %c0_153, %c0_154], %229 {strides = array<i32>} : memref<1x4x4x8x256xf32, #tpu.memory_space<vmem>>, vector<1x1x1x8x256xf32>,
    %c0_155 = arith.constant 0 : index
    %c1_156 = arith.constant 1 : index
    %c2_157 = arith.constant 2 : index
    %c0_158 = arith.constant 0 : index
    %c0_159 = arith.constant 0 : index
    %230 = vector.load %arg5[%c0_155, %c1_156, %c2_157, %c0_158, %c0_159] : memref<1x4x4x8x256xf32, #tpu.memory_space<vmem>>, vector<1x1x1x8x256xf32>
    %231 = vector.shape_cast %230 : vector<1x1x1x8x256xf32> to vector<8x256xf32>
    %232 = vector.shape_cast %215 : vector<8x256xf32> to vector<1x1x1x8x256xf32>
    tpu.vector_store %arg5[%c0_155, %c1_156, %c2_157, %c0_158, %c0_159], %232 {strides = array<i32>} : memref<1x4x4x8x256xf32, #tpu.memory_space<vmem>>, vector<1x1x1x8x256xf32>,
    %c0_160 = arith.constant 0 : index
    %c1_161 = arith.constant 1 : index
    %c3_162 = arith.constant 3 : index
    %c0_163 = arith.constant 0 : index
    %c0_164 = arith.constant 0 : index
    %233 = vector.load %arg5[%c0_160, %c1_161, %c3_162, %c0_163, %c0_164] : memref<1x4x4x8x256xf32, #tpu.memory_space<vmem>>, vector<1x1x1x8x256xf32>
    %234 = vector.shape_cast %233 : vector<1x1x1x8x256xf32> to vector<8x256xf32>
    %235 = vector.shape_cast %223 : vector<8x256xf32> to vector<1x1x1x8x256xf32>
    tpu.vector_store %arg5[%c0_160, %c1_161, %c3_162, %c0_163, %c0_164], %235 {strides = array<i32>} : memref<1x4x4x8x256xf32, #tpu.memory_space<vmem>>, vector<1x1x1x8x256xf32>,
    %c32_165 = arith.constant 32 : index
    %c17_166 = arith.constant 17 : index
    %236 = vector.load %arg8[%c32_165, %c17_166] : memref<64x290xf32, #tpu.memory_space<vmem>>, vector<8x256xf32>
    %c40_167 = arith.constant 40 : index
    %c17_168 = arith.constant 17 : index
    %237 = vector.load %arg8[%c40_167, %c17_168] : memref<64x290xf32, #tpu.memory_space<vmem>>, vector<8x256xf32>
    %c40_169 = arith.constant 40 : index
    %c16_170 = arith.constant 16 : index
    %238 = vector.load %arg8[%c40_169, %c16_170] : memref<64x290xf32, #tpu.memory_space<vmem>>, vector<8x256xf32>
    %239 = vector.broadcast %11 : vector<1x256xf32> to vector<8x256xf32>
    %240 = arith.mulf %238, %239 : vector<8x256xf32>
    %c32_171 = arith.constant 32 : index
    %c18_172 = arith.constant 18 : index
    %241 = vector.load %arg8[%c32_171, %c18_172] : memref<64x290xf32, #tpu.memory_space<vmem>>, vector<8x256xf32>
    %242 = vector.broadcast %13 : vector<1x256xf32> to vector<8x256xf32>
    %243 = arith.mulf %241, %242 : vector<8x256xf32>
    %cst_173 = arith.constant 7.500000e-01 : f32
    %244 = vector.broadcast %cst_173 : f32 to vector<8x256xf32>
    %245 = arith.mulf %244, %236 : vector<8x256xf32>
    %246 = vector.broadcast %8 : vector<1x256xf32> to vector<8x256xf32>
    %247 = arith.mulf %246, %236 : vector<8x256xf32>
    %248 = arith.addf %240, %247 : vector<8x256xf32>
    %cst_174 = arith.constant 2.500000e-01 : f32
    %249 = vector.broadcast %cst_174 : f32 to vector<8x256xf32>
    %250 = arith.mulf %249, %248 : vector<8x256xf32>
    %251 = arith.addf %245, %250 : vector<8x256xf32>
    %cst_175 = arith.constant 7.500000e-01 : f32
    %252 = vector.broadcast %cst_175 : f32 to vector<8x256xf32>
    %253 = arith.mulf %252, %236 : vector<8x256xf32>
    %cst_176 = arith.constant 2.500000e-01 : f32
    %254 = vector.broadcast %cst_176 : f32 to vector<8x256xf32>
    %255 = arith.mulf %254, %237 : vector<8x256xf32>
    %256 = arith.addf %253, %255 : vector<8x256xf32>
    %cst_177 = arith.constant 2.500000e-01 : f32
    %257 = vector.broadcast %cst_177 : f32 to vector<8x256xf32>
    %258 = arith.mulf %257, %236 : vector<8x256xf32>
    %cst_178 = arith.constant 7.500000e-01 : f32
    %259 = vector.broadcast %cst_178 : f32 to vector<8x256xf32>
    %260 = arith.mulf %259, %237 : vector<8x256xf32>
    %261 = arith.addf %258, %260 : vector<8x256xf32>
    %cst_179 = arith.constant 7.500000e-01 : f32
    %262 = vector.broadcast %cst_179 : f32 to vector<8x256xf32>
    %263 = arith.mulf %262, %237 : vector<8x256xf32>
    %264 = vector.broadcast %9 : vector<1x256xf32> to vector<8x256xf32>
    %265 = arith.mulf %264, %237 : vector<8x256xf32>
    %266 = arith.addf %243, %265 : vector<8x256xf32>
    %cst_180 = arith.constant 2.500000e-01 : f32
    %267 = vector.broadcast %cst_180 : f32 to vector<8x256xf32>
    %268 = arith.mulf %267, %266 : vector<8x256xf32>
    %269 = arith.addf %263, %268 : vector<8x256xf32>
    %c0_181 = arith.constant 0 : index
    %c2_182 = arith.constant 2 : index
    %c0_183 = arith.constant 0 : index
    %c0_184 = arith.constant 0 : index
    %c0_185 = arith.constant 0 : index
    %270 = vector.load %arg5[%c0_181, %c2_182, %c0_183, %c0_184, %c0_185] : memref<1x4x4x8x256xf32, #tpu.memory_space<vmem>>, vector<1x1x1x8x256xf32>
    %271 = vector.shape_cast %270 : vector<1x1x1x8x256xf32> to vector<8x256xf32>
    %272 = vector.shape_cast %251 : vector<8x256xf32> to vector<1x1x1x8x256xf32>
    tpu.vector_store %arg5[%c0_181, %c2_182, %c0_183, %c0_184, %c0_185], %272 {strides = array<i32>} : memref<1x4x4x8x256xf32, #tpu.memory_space<vmem>>, vector<1x1x1x8x256xf32>,
    %c0_186 = arith.constant 0 : index
    %c2_187 = arith.constant 2 : index
    %c1_188 = arith.constant 1 : index
    %c0_189 = arith.constant 0 : index
    %c0_190 = arith.constant 0 : index
    %273 = vector.load %arg5[%c0_186, %c2_187, %c1_188, %c0_189, %c0_190] : memref<1x4x4x8x256xf32, #tpu.memory_space<vmem>>, vector<1x1x1x8x256xf32>
    %274 = vector.shape_cast %273 : vector<1x1x1x8x256xf32> to vector<8x256xf32>
    %275 = vector.shape_cast %256 : vector<8x256xf32> to vector<1x1x1x8x256xf32>
    tpu.vector_store %arg5[%c0_186, %c2_187, %c1_188, %c0_189, %c0_190], %275 {strides = array<i32>} : memref<1x4x4x8x256xf32, #tpu.memory_space<vmem>>, vector<1x1x1x8x256xf32>,
    %c0_191 = arith.constant 0 : index
    %c2_192 = arith.constant 2 : index
    %c2_193 = arith.constant 2 : index
    %c0_194 = arith.constant 0 : index
    %c0_195 = arith.constant 0 : index
    %276 = vector.load %arg5[%c0_191, %c2_192, %c2_193, %c0_194, %c0_195] : memref<1x4x4x8x256xf32, #tpu.memory_space<vmem>>, vector<1x1x1x8x256xf32>
    %277 = vector.shape_cast %276 : vector<1x1x1x8x256xf32> to vector<8x256xf32>
    %278 = vector.shape_cast %261 : vector<8x256xf32> to vector<1x1x1x8x256xf32>
    tpu.vector_store %arg5[%c0_191, %c2_192, %c2_193, %c0_194, %c0_195], %278 {strides = array<i32>} : memref<1x4x4x8x256xf32, #tpu.memory_space<vmem>>, vector<1x1x1x8x256xf32>,
    %c0_196 = arith.constant 0 : index
    %c2_197 = arith.constant 2 : index
    %c3_198 = arith.constant 3 : index
    %c0_199 = arith.constant 0 : index
    %c0_200 = arith.constant 0 : index
    %279 = vector.load %arg5[%c0_196, %c2_197, %c3_198, %c0_199, %c0_200] : memref<1x4x4x8x256xf32, #tpu.memory_space<vmem>>, vector<1x1x1x8x256xf32>
    %280 = vector.shape_cast %279 : vector<1x1x1x8x256xf32> to vector<8x256xf32>
    %281 = vector.shape_cast %269 : vector<8x256xf32> to vector<1x1x1x8x256xf32>
    tpu.vector_store %arg5[%c0_196, %c2_197, %c3_198, %c0_199, %c0_200], %281 {strides = array<i32>} : memref<1x4x4x8x256xf32, #tpu.memory_space<vmem>>, vector<1x1x1x8x256xf32>,
    %c48_201 = arith.constant 48 : index
    %c17_202 = arith.constant 17 : index
    %282 = vector.load %arg8[%c48_201, %c17_202] : memref<64x290xf32, #tpu.memory_space<vmem>>, vector<8x256xf32>
    %c56_203 = arith.constant 56 : index
    %c17_204 = arith.constant 17 : index
    %283 = vector.load %arg8[%c56_203, %c17_204] : memref<64x290xf32, #tpu.memory_space<vmem>>, vector<8x256xf32>
    %c56_205 = arith.constant 56 : index
    %c16_206 = arith.constant 16 : index
    %284 = vector.load %arg8[%c56_205, %c16_206] : memref<64x290xf32, #tpu.memory_space<vmem>>, vector<8x256xf32>
    %285 = vector.broadcast %11 : vector<1x256xf32> to vector<8x256xf32>
    %286 = arith.mulf %284, %285 : vector<8x256xf32>
    %c48_207 = arith.constant 48 : index
    %c18_208 = arith.constant 18 : index
    %287 = vector.load %arg8[%c48_207, %c18_208] : memref<64x290xf32, #tpu.memory_space<vmem>>, vector<8x256xf32>
    %288 = vector.broadcast %13 : vector<1x256xf32> to vector<8x256xf32>
    %289 = arith.mulf %287, %288 : vector<8x256xf32>
    %cst_209 = arith.constant 7.500000e-01 : f32
    %290 = vector.broadcast %cst_209 : f32 to vector<8x256xf32>
    %291 = arith.mulf %290, %282 : vector<8x256xf32>
    %292 = vector.broadcast %8 : vector<1x256xf32> to vector<8x256xf32>
    %293 = arith.mulf %292, %282 : vector<8x256xf32>
    %294 = arith.addf %286, %293 : vector<8x256xf32>
    %cst_210 = arith.constant 2.500000e-01 : f32
    %295 = vector.broadcast %cst_210 : f32 to vector<8x256xf32>
    %296 = arith.mulf %295, %294 : vector<8x256xf32>
    %297 = arith.addf %291, %296 : vector<8x256xf32>
    %cst_211 = arith.constant 7.500000e-01 : f32
    %298 = vector.broadcast %cst_211 : f32 to vector<8x256xf32>
    %299 = arith.mulf %298, %282 : vector<8x256xf32>
    %cst_212 = arith.constant 2.500000e-01 : f32
    %300 = vector.broadcast %cst_212 : f32 to vector<8x256xf32>
    %301 = arith.mulf %300, %283 : vector<8x256xf32>
    %302 = arith.addf %299, %301 : vector<8x256xf32>
    %cst_213 = arith.constant 2.500000e-01 : f32
    %303 = vector.broadcast %cst_213 : f32 to vector<8x256xf32>
    %304 = arith.mulf %303, %282 : vector<8x256xf32>
    %cst_214 = arith.constant 7.500000e-01 : f32
    %305 = vector.broadcast %cst_214 : f32 to vector<8x256xf32>
    %306 = arith.mulf %305, %283 : vector<8x256xf32>
    %307 = arith.addf %304, %306 : vector<8x256xf32>
    %cst_215 = arith.constant 7.500000e-01 : f32
    %308 = vector.broadcast %cst_215 : f32 to vector<8x256xf32>
    %309 = arith.mulf %308, %283 : vector<8x256xf32>
    %310 = vector.broadcast %9 : vector<1x256xf32> to vector<8x256xf32>
    %311 = arith.mulf %310, %283 : vector<8x256xf32>
    %312 = arith.addf %289, %311 : vector<8x256xf32>
    %cst_216 = arith.constant 2.500000e-01 : f32
    %313 = vector.broadcast %cst_216 : f32 to vector<8x256xf32>
    %314 = arith.mulf %313, %312 : vector<8x256xf32>
    %315 = arith.addf %309, %314 : vector<8x256xf32>
    %c0_217 = arith.constant 0 : index
    %c3_218 = arith.constant 3 : index
    %c0_219 = arith.constant 0 : index
    %c0_220 = arith.constant 0 : index
    %c0_221 = arith.constant 0 : index
    %316 = vector.load %arg5[%c0_217, %c3_218, %c0_219, %c0_220, %c0_221] : memref<1x4x4x8x256xf32, #tpu.memory_space<vmem>>, vector<1x1x1x8x256xf32>
    %317 = vector.shape_cast %316 : vector<1x1x1x8x256xf32> to vector<8x256xf32>
    %318 = vector.shape_cast %297 : vector<8x256xf32> to vector<1x1x1x8x256xf32>
    tpu.vector_store %arg5[%c0_217, %c3_218, %c0_219, %c0_220, %c0_221], %318 {strides = array<i32>} : memref<1x4x4x8x256xf32, #tpu.memory_space<vmem>>, vector<1x1x1x8x256xf32>,
    %c0_222 = arith.constant 0 : index
    %c3_223 = arith.constant 3 : index
    %c1_224 = arith.constant 1 : index
    %c0_225 = arith.constant 0 : index
    %c0_226 = arith.constant 0 : index
    %319 = vector.load %arg5[%c0_222, %c3_223, %c1_224, %c0_225, %c0_226] : memref<1x4x4x8x256xf32, #tpu.memory_space<vmem>>, vector<1x1x1x8x256xf32>
    %320 = vector.shape_cast %319 : vector<1x1x1x8x256xf32> to vector<8x256xf32>
    %321 = vector.shape_cast %302 : vector<8x256xf32> to vector<1x1x1x8x256xf32>
    tpu.vector_store %arg5[%c0_222, %c3_223, %c1_224, %c0_225, %c0_226], %321 {strides = array<i32>} : memref<1x4x4x8x256xf32, #tpu.memory_space<vmem>>, vector<1x1x1x8x256xf32>,
    %c0_227 = arith.constant 0 : index
    %c3_228 = arith.constant 3 : index
    %c2_229 = arith.constant 2 : index
    %c0_230 = arith.constant 0 : index
    %c0_231 = arith.constant 0 : index
    %322 = vector.load %arg5[%c0_227, %c3_228, %c2_229, %c0_230, %c0_231] : memref<1x4x4x8x256xf32, #tpu.memory_space<vmem>>, vector<1x1x1x8x256xf32>
    %323 = vector.shape_cast %322 : vector<1x1x1x8x256xf32> to vector<8x256xf32>
    %324 = vector.shape_cast %307 : vector<8x256xf32> to vector<1x1x1x8x256xf32>
    tpu.vector_store %arg5[%c0_227, %c3_228, %c2_229, %c0_230, %c0_231], %324 {strides = array<i32>} : memref<1x4x4x8x256xf32, #tpu.memory_space<vmem>>, vector<1x1x1x8x256xf32>,
    %c0_232 = arith.constant 0 : index
    %c3_233 = arith.constant 3 : index
    %c3_234 = arith.constant 3 : index
    %c0_235 = arith.constant 0 : index
    %c0_236 = arith.constant 0 : index
    %325 = vector.load %arg5[%c0_232, %c3_233, %c3_234, %c0_235, %c0_236] : memref<1x4x4x8x256xf32, #tpu.memory_space<vmem>>, vector<1x1x1x8x256xf32>
    %326 = vector.shape_cast %325 : vector<1x1x1x8x256xf32> to vector<8x256xf32>
    %327 = vector.shape_cast %315 : vector<8x256xf32> to vector<1x1x1x8x256xf32>
    tpu.vector_store %arg5[%c0_232, %c3_233, %c3_234, %c0_235, %c0_236], %327 {strides = array<i32>} : memref<1x4x4x8x256xf32, #tpu.memory_space<vmem>>, vector<1x1x1x8x256xf32>,
    return
  }
  func.func @transform_0(%arg0: i32) -> (i32, i32, i32) {
    %c0_i32 = arith.constant 0 : i32
    %c0_i32_0 = arith.constant 0 : i32
    %c0_i32_1 = arith.constant 0 : i32
    return %arg0, %c0_i32, %c0_i32_0 : i32, i32, i32
  }
  func.func @transform_1(%arg0: i32) -> (i32, i32) {
    %c0_i32 = arith.constant 0 : i32
    %c0_i32_0 = arith.constant 0 : i32
    %c0_i32_1 = arith.constant 0 : i32
    return %c0_i32, %c0_i32_0 : i32, i32
  }
  func.func @transform_2(%arg0: i32) -> (i32, i32) {
    %c0_i32 = arith.constant 0 : i32
    %c0_i32_0 = arith.constant 0 : i32
    %c0_i32_1 = arith.constant 0 : i32
    return %c0_i32, %c0_i32_0 : i32, i32
  }
  func.func @transform_3(%arg0: i32) -> (i32, i32) {
    %c0_i32 = arith.constant 0 : i32
    %c0_i32_0 = arith.constant 0 : i32
    %c0_i32_1 = arith.constant 0 : i32
    return %c0_i32, %c0_i32_0 : i32, i32
  }
  func.func @transform_4(%arg0: i32) -> (i32, i32, i32, i32, i32) {
    %c0_i32 = arith.constant 0 : i32
    %c0_i32_0 = arith.constant 0 : i32
    %c0_i32_1 = arith.constant 0 : i32
    %c0_i32_2 = arith.constant 0 : i32
    %c0_i32_3 = arith.constant 0 : i32
    return %arg0, %c0_i32, %c0_i32_0, %c0_i32_1, %c0_i32_2 : i32, i32, i32, i32, i32
  }
}

</mosaic_0001>

<bundles_post_ra>
// kernel: tpu_custom_call.1
= control target key start
LH: loop header
LB: loop body
LE: loop exit
PB: predicated region body
PF: predicated region fallthrough
CT: control target
= control target key end

     0   :  { %9 = vsyncpa [#allocation6], 0  ;;  %s3626_s0 = inlined_call_operand.vmem [shape: f32[2,4,256], index: 0, kind: input, shape index: {}]   ;;  %s3627_s1 = inlined_call_operand.vmem [shape: f32[128,4], index: 1, kind: input, shape index: {}]   ;;  %s3628_s2 = inlined_call_operand.vmem [shape: f32[8,1], index: 2, kind: input, shape index: {}]   ;;  %s3629_s3 = inlined_call_operand.vmem [shape: f32[4,256], index: 3, kind: input, shape index: {}]   ;;  %s3630_s4 = inlined_call_operand.hbm [shape: f32[2,4,4,8,256], index: 4, kind: output, shape index: {}]  }
   0x1   :  { %11 = vsyncpa [#allocation6 + $0x1], 0  ;;  %s2431_s15 = smov 0   ;;  %s2433_s16 = smov 0  }
   0x2   :  { %s2435_s17 = smov 0   ;;  %s2437_s18 = smov 0  }
   0x3 LB: > { %s2452_s19 = sadd.s32 4294967295, %s2388_s18   ;;  %s2185_s20 = sadd.s32 4294967294, %s2388_s18   ;;  %s2388_s18 = sphi %s2437_s18, %s3667_s18   ;;  %s2384_s17 = sphi %s2435_s17, %s3666_s17   ;;  %s2380_s16 = sphi %s2433_s16, %s3665_s16   ;;  %s2376_s15 = sphi %s2431_s15, %s3664_s15  }
   0x4   : > { %s2456_s21 = sadd.s32 1, %s2388_s18   ;;  %s113_s22 = sadd.s32 1, %s2384_s17 }
   0x5   : > { %s110_s23 = ssub.s32 %s2388_s18, %s2456_s21  ;;  %p123_p0 = scmp.ne.s32.totalorder %s2384_s17, %s2380_s16 }
   0x6   : > { %p111_p1 = scmp.eq.s32.totalorder %s110_s23, 0  ;;  %p124_p2 = scmp.eq.s32.totalorder %s2452_s19, 1 }
   0x7   : > { %p129_p3 = scmp.ne.s32.totalorder %s2380_s16, %s2376_s15  ;;  %p130_p4 = scmp.eq.s32.totalorder %s2185_s20, 1 }
   0x8   : > { %s2467_s24 = scalar_select %p111_p1, %s2384_s17, %s113_s22  }
   0x9   : > { %p2469_p5 = por %p124_p2, %p123_p0  ;;  %p2473_p6 = por %p130_p4, %p129_p3 }
   0xa   : > { %p2188_p7 = scmp.ge.s32.totalorder %s2388_s18, 1  ;;  %p165_p8 = scmp.lt.s32.totalorder %s2388_s18, 3 }
   0xc   : > { %p166_p9 = pnand %p2188_p7, %p165_p8 }
   0xe   : > { %169 = sbr.rel (%p166_p9) target bundleno = 1372 (0x55c), region = 36 }
  0x13   : > { %p191_p10 = scmp.lt.s32.totalorder %s2452_s19, 1  ;;  %vm361_vm0 = vcmask 1043456   ;;  %v292_v1 = vld [vmem:[%s3627_s1] sm:$0xff]  ;;  %vm312_vm1 = vcmask 31744   ;;  %v293_v5 = vld [vmem:[%s3627_s1 + $0x8] sm:$0xff]  ;;  %v294_v7 = vld [vmem:[%s3627_s1 + $0x10] sm:$0xff] }
  0x14   : > { %v300_v2 = vld [vmem:[%s3627_s1 + $0x40] sm:$0xff]  ;;  %v301_v6 = vld [vmem:[%s3627_s1 + $0x48] sm:$0xff]  ;;  %v302_v8 = vld [vmem:[%s3627_s1 + $0x50] sm:$0xff]  ;;  %v2390_v14 = vmov 0   ;;  %s2391_s13 = smov 16   ;;  %s2392_s14 = smov 18  }
  0x15   : > { %s192_s27 = scalar_select %p191_p10, %s2452_s19, 1  ;;  %v295_v9 = vld [vmem:[%s3627_s1 + $0x18] sm:$0xff]  ;;  %v2193_v11 = vld [vmem:[%s3629_s3 + $0x2] ss:$4 sm:$0x3]  ;;  %2323 = vset.pattern.permute.xlu0 %v2390_v14  ;;  %v297_v21 = vld [vmem:[%s3627_s1 + $0x28] sm:$0xff] }
  0x16   : > { %v303_v10 = vld [vmem:[%s3627_s1 + $0x58] sm:$0xff]  ;;  %v288_v12 = vsub.f32 1.0, %v2193_v11  ;;  %v2194_v13 = vld [vmem:[%s3629_s3 + $0x3] ss:$4 sm:$0x3]  ;;  %v305_v23 = vld [vmem:[%s3627_s1 + $0x68] sm:$0xff] }
  0x17   : > { %s2264_s28 = sshll.u32 %s192_s27, 3  ;;  %v289_v15 = vsub.f32 1.0, %v2194_v13  ;;  %v304_v16 = vld [vmem:[%s3627_s1 + $0x60] sm:$0xff]  ;;  %s2393_s30 = smov 2   ;;  %v298_v25 = vld [vmem:[%s3627_s1 + $0x30] sm:$0xff]  ;;  %v307_v27 = vld [vmem:[%s3627_s1 + $0x78] sm:$0xff] }
  0x18   : > { %s195_s5 = scalar_lea.vmem %s3626_s0, %s2264_s28  ;;  %v2533_v17 = vperm.slane %v288_v12, 1  ;;  %v2535_v18 = vperm.slane %v288_v12, 0  ;;  %v296_v19 = vld [vmem:[%s3627_s1 + $0x20] sm:$0xff]  ;;  %v306_v26 = vld [vmem:[%s3627_s1 + $0x70] sm:$0xff]  ;;  %s2394_s9 = smov 32   ;;  %v299_v28 = vld [vmem:[%s3627_s1 + $0x38] sm:$0xff] }
  0x19   : > { %v291_v0 = vld [vmem:[%s195_s5] sm:$0xff]  ;;  %v802_v20 = vperm.slane %v289_v15, 0  ;;  %v803_v24 = vperm.slane %v289_v15, 1  ;;  %s2395_s22 = smov 34   ;;  %s2396_s23 = smov 17   ;;  %vm198_vm2 = vcmask 277504  }
  0x1a   : > { %309 = vst [vmem:[#allocation1] ss:$2 sm:$0xff] %v291_v0  ;;  %719 = vrot.lane.b32.xlu0 %v2533_v17, %s2391_s13  ;;  %717 = vrot.lane.b32.xlu2 %v2535_v18, %s2391_s13  ;;  %v290_v22 = vld [vmem:[%s3628_s2] sm:$0xff]  ;;  %v2397_v53 = vmov 0.0   ;;  %vm592_vm3 = vcmask 138240   ;;  %vm657_vm4 = vcmask 1047688  }
  0x1b   : > { %804 = vrot.lane.b32.xlu1 %v802_v20, %s2392_s14  ;;  %223 = vst.msk [vmem:[#allocation2 + $0xd0] sm:$0xff] %vm198_vm2, %v2397_v53  ;;  %s2398_s27 = smov 111   ;;  %s2399_s28 = smov 127   ;;  %vm808_vm5 = vcmask 146432   ;;  %vm947_vm6 = vcmask 261120   ;;  %vm721_vm7 = vcmask 130048  }
  0x1c   : > { %196 = vst [vmem:[#allocation2] sm:$0xff] %v2397_v53  ;;  %s2400_s29 = smov 112   ;;  %s2402_s5 = smov 1   ;;  %vm861_vm8 = vcmask 15360   ;;  %vm825_vm9 = vcmask 1039360   ;;  %vm1048_vm10 = vcmask 908288  }
  0x1d   : > { %199 = vst.msk [vmem:[#allocation2 + $0x10] sm:$0xff] %vm198_vm2, %v2397_v53  ;;  %s2403_s6 = smov 15   ;;  %vm931_vm11 = vcmask 916480   ;;  %vm738_vm12 = vcmask 7168   ;;  %vm964_vm13 = vcmask 924672   ;;  %vm878_vm14 = vcmask 121856  }
  0x1e   : > { %200 = vst [vmem:[#allocation2 + $0x18] sm:$0xff] %v2397_v53  ;;  %vm1166_vm15 = vcmask 269312   ;;  %s2346_s20 = scalar_lea.hbm %s3630_s4, 512 }
  0x1f   : > { %202 = vst.msk [vmem:[#allocation2 + $0x28] sm:$0xff] %vm198_vm2, %v2397_v53 }
  0x20   : > { %203 = vst [vmem:[#allocation2 + $0x30] sm:$0xff] %v2397_v53 }
  0x21   : > { %v310_v3 = vld.sshfl [vmem:[#allocation1] sm:$0xff pattern:$0x75316420]  ;;  %v311_v4 = vld.sshfl [vmem:[#allocation1 + $0x8] sm:$0xff pattern:$0x75316420] }
  0x22   : > { %2195 = vmatpush.msk.msra.mxu0 %vm361_vm0, %v310_v3  ;;  %2266 = vmatpush.msk.msra.mxu2 %vm361_vm0, %v310_v3  ;;  %205 = vst.msk [vmem:[#allocation2 + $0x40] sm:$0xff] %vm198_vm2, %v2397_v53 }
  0x23   : > { %2267 = vmatpush.msk.msra.mxu3 %vm361_vm0, %v311_v4  ;;  %2196 = vmatmul.msk.f32.vlgmr.msra.gmra.mxu0 %vm312_vm1, %v292_v1  ;;  %206 = vst [vmem:[#allocation2 + $0x48] sm:$0xff] %v2397_v53 }
  0x24   : > { %2204 = vmatmul.msk.f32.vlgmr.msra.gmra.mxu2 %vm312_vm1, %v300_v2  ;;  %2221 = vmatmul.msk.f32.vlgmr.msra.gmra.mxu3 %vm312_vm1, %v300_v2  ;;  %208 = vst.msk [vmem:[#allocation2 + $0x58] sm:$0xff] %vm198_vm2, %v2397_v53 }
  0x25   : > { %2212 = vmatpush.msk.msra.mxu1 %vm361_vm0, %v311_v4  ;;  %786 = vperm.xlu0 %2323, %v290_v22   ;;  %209 = vst [vmem:[#allocation2 + $0x60] sm:$0xff] %v2397_v53 }
  0x26   : > { %2213 = vmatmul.msk.f32.vlgmr.msra.gmra.mxu1 %vm312_vm1, %v292_v1  ;;  %857 = vrot.lane.b32.xlu1 %v802_v20, %s2393_s30  ;;  %211 = vst.msk [vmem:[#allocation2 + $0x70] sm:$0xff] %vm198_vm2, %v2397_v53 }
  0x27   : > { %806 = vrot.lane.b32.xlu2 %v803_v24, %s2392_s14  ;;  %212 = vst [vmem:[#allocation2 + $0x78] sm:$0xff] %v2397_v53 }
  0x28   : > { %214 = vst.msk [vmem:[#allocation2 + $0x88] sm:$0xff] %vm198_vm2, %v2397_v53 }
  0x29   : > { %215 = vst [vmem:[#allocation2 + $0x90] sm:$0xff] %v2397_v53 }
  0x2a   : > { %217 = vst.msk [vmem:[#allocation2 + $0xa0] sm:$0xff] %vm198_vm2, %v2397_v53 }
  0x2b   : > { %2197 = vmatmul.msk.f32.gmra.mxu0 %vm312_vm1, %v293_v5  ;;  %218 = vst [vmem:[#allocation2 + $0xa8] sm:$0xff] %v2397_v53 }
  0x2c   : > { %2205 = vmatmul.msk.f32.gmra.mxu2 %vm312_vm1, %v301_v6  ;;  %2222 = vmatmul.msk.f32.gmra.mxu3 %vm312_vm1, %v301_v6  ;;  %220 = vst.msk [vmem:[#allocation2 + $0xb8] sm:$0xff] %vm198_vm2, %v2397_v53 }
  0x2d   : > { %943 = vrot.lane.b32.xlu0 %v2535_v18, %s2394_s9  ;;  %221 = vst [vmem:[#allocation2 + $0xc0] sm:$0xff] %v2397_v53 }
  0x2e   : > { %2214 = vmatmul.msk.f32.gmra.mxu1 %vm312_vm1, %v293_v5  ;;  %945 = vrot.lane.b32.xlu1 %v2533_v17, %s2394_s9  ;;  %224 = vst [vmem:[#allocation2 + $0xd8] sm:$0xff] %v2397_v53  ;;  %s2404_s9 = smov 33  }
  0x2f   : > { %859 = vrot.lane.b32.xlu2 %v803_v24, %s2393_s30  ;;  %226 = vst.msk [vmem:[#allocation2 + $0xe8] sm:$0xff] %vm198_vm2, %v2397_v53  ;;  %s2401_s30 = smov 113  }
  0x30   : > { %227 = vst [vmem:[#allocation2 + $0xf0] sm:$0xff] %v2397_v53 }
  0x31   : > { %229 = vst.msk [vmem:[#allocation2 + $0x100] sm:$0xff] %vm198_vm2, %v2397_v53 }
  0x32   : > { %230 = vst [vmem:[#allocation2 + $0x108] sm:$0xff] %v2397_v53 }
  0x33   : > { %2198 = vmatmul.msk.f32.gmra.mxu0 %vm312_vm1, %v294_v7  ;;  %232 = vst.msk [vmem:[#allocation2 + $0x118] sm:$0xff] %vm198_vm2, %v2397_v53 }
  0x34   : > { %2223 = vmatmul.msk.f32.gmra.mxu3 %vm312_vm1, %v302_v8  ;;  %2206 = vmatmul.msk.f32.gmra.mxu2 %vm312_vm1, %v302_v8  ;;  %233 = vst [vmem:[#allocation2 + $0x120] sm:$0xff] %v2397_v53 }
  0x35   : > { %1030 = vrot.lane.b32.xlu0 %v803_v24, %s2395_s22  ;;  %235 = vst.msk [vmem:[#allocation2 + $0x130] sm:$0xff] %vm198_vm2, %v2397_v53 }
  0x36   : > { %2215 = vmatmul.msk.f32.gmra.mxu1 %vm312_vm1, %v294_v7  ;;  %236 = vst [vmem:[#allocation2 + $0x138] sm:$0xff] %v2397_v53 }
  0x37   : > { %1028 = vrot.lane.b32.xlu2 %v802_v20, %s2395_s22  ;;  %238 = vst.msk [vmem:[#allocation2 + $0x148] sm:$0xff] %vm198_vm2, %v2397_v53 }
  0x38   : > { %239 = vst [vmem:[#allocation2 + $0x150] sm:$0xff] %v2397_v53 }
  0x39   : > { %241 = vst.msk [vmem:[#allocation2 + $0x160] sm:$0xff] %vm198_vm2, %v2397_v53 }
  0x3a   : > { %242 = vst [vmem:[#allocation2 + $0x168] sm:$0xff] %v2397_v53 }
  0x3b   : > { %2199 = vmatmul.msk.f32.gmra.mxu0 %vm312_vm1, %v295_v9  ;;  %245 = vst [vmem:[#allocation3] sm:$0xff] %v2397_v53 }
  0x3c   : > { %2207 = vmatmul.msk.f32.gmra.mxu2 %vm312_vm1, %v303_v10  ;;  %2224 = vmatmul.msk.f32.gmra.mxu3 %vm312_vm1, %v303_v10  ;;  %247 = vst.msk [vmem:[#allocation3 + $0x10] sm:$0xff] %vm198_vm2, %v2397_v53 }
  0x3d   : > { %248 = vst [vmem:[#allocation3 + $0x18] sm:$0xff] %v2397_v53 }
  0x3e   : > { %2216 = vmatmul.msk.f32.gmra.mxu1 %vm312_vm1, %v295_v9  ;;  %250 = vst.msk [vmem:[#allocation3 + $0x28] sm:$0xff] %vm198_vm2, %v2397_v53 }
  0x3f   : > { %251 = vst [vmem:[#allocation3 + $0x30] sm:$0xff] %v2397_v53 }
  0x40   : > { %253 = vst.msk [vmem:[#allocation3 + $0x40] sm:$0xff] %vm198_vm2, %v2397_v53 }
  0x41   : > { %254 = vst [vmem:[#allocation3 + $0x48] sm:$0xff] %v2397_v53 }
  0x42   : > { %256 = vst.msk [vmem:[#allocation3 + $0x58] sm:$0xff] %vm198_vm2, %v2397_v53 }
  0x43   : > { %2200 = vmatmul.msk.f32.gmra.mxu0 %vm312_vm1, %v296_v19  ;;  %257 = vst [vmem:[#allocation4] sm:$0xff] %v2397_v53 }
  0x44   : > { %2208 = vmatmul.msk.f32.gmra.mxu2 %vm312_vm1, %v304_v16  ;;  %2225 = vmatmul.msk.f32.gmra.mxu3 %vm312_vm1, %v304_v16  ;;  %259 = vst.msk [vmem:[#allocation4 + $0x10] sm:$0xff] %vm198_vm2, %v2397_v53 }
  0x45   : > { %260 = vst [vmem:[#allocation4 + $0x18] sm:$0xff] %v2397_v53 }
  0x46   : > { %2217 = vmatmul.msk.f32.gmra.mxu1 %vm312_vm1, %v296_v19  ;;  %262 = vst.msk [vmem:[#allocation4 + $0x28] sm:$0xff] %vm198_vm2, %v2397_v53 }
  0x47   : > { %263 = vst [vmem:[#allocation4 + $0x30] sm:$0xff] %v2397_v53 }
  0x48   : > { %265 = vst.msk [vmem:[#allocation4 + $0x40] sm:$0xff] %vm198_vm2, %v2397_v53 }
  0x49   : > { %266 = vst [vmem:[#allocation4 + $0x48] sm:$0xff] %v2397_v53 }
  0x4a   : > { %268 = vst.msk [vmem:[#allocation4 + $0x58] sm:$0xff] %vm198_vm2, %v2397_v53 }
  0x4b   : > { %2201 = vmatmul.msk.f32.gmra.mxu0 %vm312_vm1, %v297_v21  ;;  %269 = vst [vmem:[#allocation4 + $0x60] sm:$0xff] %v2397_v53 }
  0x4c   : > { %2226 = vmatmul.msk.f32.gmra.mxu3 %vm312_vm1, %v305_v23  ;;  %2209 = vmatmul.msk.f32.gmra.mxu2 %vm312_vm1, %v305_v23  ;;  %271 = vst.msk [vmem:[#allocation4 + $0x70] sm:$0xff] %vm198_vm2, %v2397_v53 }
  0x4d   : > { %272 = vst [vmem:[#allocation4 + $0x78] sm:$0xff] %v2397_v53 }
  0x4e   : > { %2218 = vmatmul.msk.f32.gmra.mxu1 %vm312_vm1, %v297_v21  ;;  %274 = vst.msk [vmem:[#allocation4 + $0x88] sm:$0xff] %vm198_vm2, %v2397_v53 }
  0x4f   : > { %275 = vst [vmem:[#allocation4 + $0x90] sm:$0xff] %v2397_v53 }
  0x50   : > { %277 = vst.msk [vmem:[#allocation4 + $0xa0] sm:$0xff] %vm198_vm2, %v2397_v53 }
  0x51   : > { %278 = vst [vmem:[#allocation4 + $0xa8] sm:$0xff] %v2397_v53 }
  0x52   : > { %280 = vst.msk [vmem:[#allocation4 + $0xb8] sm:$0xff] %vm198_vm2, %v2397_v53 }
  0x53   : > { %2202 = vmatmul.msk.f32.gmra.mxu0 %vm312_vm1, %v298_v25 }
  0x54   : > { %2227 = vmatmul.msk.f32.gmra.mxu3 %vm312_vm1, %v306_v26  ;;  %2210 = vmatmul.msk.f32.gmra.mxu2 %vm312_vm1, %v306_v26 }
  0x56   : > { %2219 = vmatmul.msk.f32.gmra.mxu1 %vm312_vm1, %v298_v25 }
  0x5b   : > { %2203 = vmatmul.msk.f32.gmra.mxu0 %vm312_vm1, %v299_v28 }
  0x5c   : > { %2211 = vmatmul.msk.f32.gmra.mxu2 %vm312_vm1, %v307_v27  ;;  %2228 = vmatmul.msk.f32.gmra.mxu3 %vm312_vm1, %v307_v27 }
  0x5e   : > { %2220 = vmatmul.msk.f32.gmra.mxu1 %vm312_vm1, %v299_v28 }
  0x74   : > { %v2607_v52 = vpop.permute.xlu2 %717 }
  0x81   : > { %v2627_v57 = vpop.permute.xlu2 %806 }
  0x89   : > { %v2649_v62 = vpop.permute.xlu2 %859 }
  0x8c   : > { %v2644_v61 = vpop.permute.xlu0 %719 }
  0x8d   : > { %v2680_v4 = vpop.permute.xlu1 %804 }
  0x91   : > { %v1029_v3 = vpop.permute.xlu2 %1028 }
  0x97   : > { %v2666_v1 = vpop.permute.xlu0 %786 }
  0x98   : > { %v2699_v7 = vpop.permute.xlu1 %857 }
  0x9f   : > { %v2685_v5 = vpop.permute.xlu0 %943 }
  0xa0   : > { %v383_v29 = vpop.f32.mrf.mxu0  ;;  %v2716_v10 = vpop.permute.xlu1 %945 }
  0xa1   : > { %528 = vrot.lane.b32.xlu0 %v383_v29, %s2396_s23 }
  0xa3   : > { %v448_v30 = vpop.f32.mrf.mxu1 }
  0xa7   : > { %v407_v31 = vpop.f32.mrf.mxu2  ;;  %v472_v32 = vpop.f32.mrf.mxu3 }
  0xa8   : > { %562 = vrot.lane.b32.xlu2 %v472_v32, %s2396_s23  ;;  %560 = vrot.lane.b32.xlu1 %v407_v31, %s2396_s23  ;;  %v386_v33 = vpop.f32.mrf.mxu0  ;;  %v1031_v8 = vpop.permute.xlu0 %1030 }
  0xa9   : > { %530 = vrot.lane.b32.xlu0 %v448_v30, %s2396_s23  ;;  %v1032_v21 = vsel %vm198_vm2, %v1029_v3, %v1031_v8 }
  0xab   : > { %v451_v34 = vpop.f32.mrf.mxu1 }
  0xaf   : > { %v410_v35 = vpop.f32.mrf.mxu2  ;;  %v475_v36 = vpop.f32.mrf.mxu3 }
  0xb0   : > { %532 = vrot.lane.b32.xlu1 %v386_v33, %s2396_s23  ;;  %v389_v37 = vpop.f32.mrf.mxu0 }
  0xb1   : > { %564 = vrot.lane.b32.xlu0 %v410_v35, %s2396_s23  ;;  %536 = vrot.lane.b32.xlu2 %v389_v37, %s2396_s23 }
  0xb3   : > { %v454_v38 = vpop.f32.mrf.mxu1 }
  0xb7   : > { %v478_v39 = vpop.f32.mrf.mxu3  ;;  %v413_v40 = vpop.f32.mrf.mxu2 }
  0xb8   : > { %534 = vrot.lane.b32.xlu1 %v451_v34, %s2396_s23  ;;  %v392_v42 = vpop.f32.mrf.mxu0 }
  0xb9   : > { %570 = vrot.lane.b32.xlu0 %v478_v39, %s2396_s23  ;;  %538 = vrot.lane.b32.xlu2 %v454_v38, %s2396_s23 }
  0xbb   : > { %v457_v41 = vpop.f32.mrf.mxu1 }
  0xbf   : > { %v481_v43 = vpop.f32.mrf.mxu3  ;;  %v416_v44 = vpop.f32.mrf.mxu2 }
  0xc0   : > { %566 = vrot.lane.b32.xlu1 %v475_v36, %s2396_s23  ;;  %v395_v46 = vpop.f32.mrf.mxu0 }
  0xc1   : > { %568 = vrot.lane.b32.xlu2 %v413_v40, %s2396_s23  ;;  %540 = vrot.lane.b32.xlu0 %v392_v42, %s2396_s23 }
  0xc3   : > { %v460_v45 = vpop.f32.mrf.mxu1 }
  0xc7   : > { %v484_v47 = vpop.f32.mrf.mxu3  ;;  %v419_v48 = vpop.f32.mrf.mxu2 }
  0xc8   : > { %542 = vrot.lane.b32.xlu1 %v457_v41, %s2396_s23  ;;  %v398_v50 = vpop.f32.mrf.mxu0 }
  0xc9   : > { %574 = vrot.lane.b32.xlu2 %v481_v43, %s2396_s23  ;;  %546 = vrot.lane.b32.xlu0 %v460_v45, %s2396_s23  ;;  %v2756_v43 = vsel %vm808_vm5, %v2680_v4, %v2627_v57 }
  0xcb   : > { %v463_v49 = vpop.f32.mrf.mxu1 }
  0xcf   : > { %v487_v51 = vpop.f32.mrf.mxu3  ;;  %v422_v56 = vpop.f32.mrf.mxu2 }
  0xd0   : > { %572 = vrot.lane.b32.xlu1 %v416_v44, %s2396_s23  ;;  %v401_v55 = vpop.f32.mrf.mxu0 }
  0xd1   : > { %576 = vrot.lane.b32.xlu0 %v419_v48, %s2396_s23  ;;  %544 = vrot.lane.b32.xlu2 %v395_v46, %s2396_s23 }
  0xd3   : > { %v466_v54 = vpop.f32.mrf.mxu1 }
  0xd7   : > { %v490_v58 = vpop.f32.mrf.mxu3  ;;  %v425_v60 = vpop.f32.mrf.mxu2 }
  0xd8   : > { %578 = vrot.lane.b32.xlu1 %v484_v47, %s2396_s23  ;;  %v404_v63 = vpop.f32.mrf.mxu0 }
  0xd9   : > { %582 = vrot.lane.b32.xlu0 %v487_v51, %s2396_s23  ;;  %550 = vrot.lane.b32.xlu2 %v463_v49, %s2396_s23 }
  0xdb   : > { %v469_v59 = vpop.f32.mrf.mxu1 }
  0xdf   : > { %v428_v0 = vpop.f32.mrf.mxu2  ;;  %v493_v2 = vpop.f32.mrf.mxu3 }
  0xe0   : > { %548 = vrot.lane.b32.xlu1 %v398_v50, %s2396_s23 }
  0xe1   : > { %580 = vrot.lane.b32.xlu2 %v422_v56, %s2396_s23  ;;  %552 = vrot.lane.b32.xlu0 %v401_v55, %s2396_s23 }
  0xe8   : > { %554 = vrot.lane.b32.xlu1 %v466_v54, %s2396_s23 }
  0xe9   : > { %586 = vrot.lane.b32.xlu2 %v490_v58, %s2396_s23  ;;  %558 = vrot.lane.b32.xlu0 %v469_v59, %s2396_s23 }
  0xf0   : > { %584 = vrot.lane.b32.xlu1 %v425_v60, %s2396_s23 }
  0xf1   : > { %556 = vrot.lane.b32.xlu2 %v404_v63, %s2396_s23  ;;  %588 = vrot.lane.b32.xlu0 %v428_v0, %s2396_s23  ;;  %v948_v0 = vsel %vm947_vm6, %v2685_v5, %v2716_v10 }
  0xf8   : > { %590 = vrot.lane.b32.xlu1 %v493_v2, %s2396_s23 }
 0x102   : > { %v563_v6 = vpop.permute.xlu2 %562 }
 0x103   : > { %684 = vst.msk [vmem:[#allocation2 + $0xd0] sm:$0xff] %vm592_vm3, %v563_v6 }
 0x10a   : > { %v984_v25 = vld [vmem:[#allocation2 + $0xd0] sm:$0xff] }
 0x10b   : > { %v537_v9 = vpop.permute.xlu2 %536  ;;  %v987_v29 = vmul.f32 %v984_v25, %v2627_v57 }
 0x10c   : > { %664 = vst.msk [vmem:[#allocation2 + $0x30] sm:$0xff] %vm657_vm4, %v537_v9 }
 0x113   : > { %v529_v11 = vpop.permute.xlu0 %528  ;;  %v539_v12 = vpop.permute.xlu2 %538  ;;  %v1005_v55 = vld [vmem:[#allocation2 + $0x30] sm:$0xff] }
 0x114   : > { %658 = vst.msk [vmem:[#allocation2] sm:$0xff] %vm657_vm4, %v529_v11  ;;  %v2721_v13 = vsel %vm592_vm3, %v537_v9, %v539_v12  ;;  %v2783_v9 = vsel %vm721_vm7, %v2607_v52, %v2644_v61 }
 0x115   : > { %666 = vst.msk [vmem:[#allocation2 + $0x40] sm:$0xff] %vm592_vm3, %v539_v12 }
 0x11a   : > { %v561_v14 = vpop.permute.xlu1 %560 }
 0x11b   : > { %v601_v15 = vsel %vm592_vm3, %v561_v14, %v563_v6  ;;  %682 = vst.msk [vmem:[#allocation2 + $0xc0] sm:$0xff] %vm657_vm4, %v561_v14  ;;  %v531_v16 = vpop.permute.xlu0 %530  ;;  %v569_v19 = vpop.permute.xlu2 %568  ;;  %v1025_v20 = vld [vmem:[#allocation2] sm:$0xff] }
 0x11c   : > { %v593_v22 = vsel %vm592_vm3, %v529_v11, %v531_v16  ;;  %v1036_v23 = vmul.f32 %v1029_v3, %v1025_v20  ;;  %660 = vst.msk [vmem:[#allocation2 + $0x10] sm:$0xff] %vm592_vm3, %v531_v16  ;;  %v1007_v44 = vld [vmem:[#allocation2 + $0x40] sm:$0xff]  ;;  %v986_v45 = vmul.f32 %v2756_v43, %v601_v15 }
 0x11d   : > { %v1037_v24 = vmul.f32 %v1032_v21, %v593_v22  ;;  %688 = vst.msk [vmem:[#allocation2 + $0xf0] sm:$0xff] %vm657_vm4, %v569_v19 }
 0x11e   : > { %1042 = vrot.lane.b32.xlu1 %v1036_v23, %s2398_s27 }
 0x11f   : > { %1044 = vrot.lane.b32.xlu2 %v1037_v24, %s2398_s27 }
 0x122   : > { %v533_v26 = vpop.permute.xlu1 %532  ;;  %v982_v46 = vld [vmem:[#allocation2 + $0xc0] sm:$0xff] }
 0x123   : > { %661 = vst.msk [vmem:[#allocation2 + $0x18] sm:$0xff] %vm657_vm4, %v533_v26  ;;  %v565_v27 = vpop.permute.xlu0 %564  ;;  %v575_v28 = vpop.permute.xlu2 %574  ;;  %v1027_v30 = vld [vmem:[#allocation2 + $0x10] sm:$0xff]  ;;  %v985_v47 = vmul.f32 %v982_v46, %v2680_v4 }
 0x124   : > { %685 = vst.msk [vmem:[#allocation2 + $0xd8] sm:$0xff] %vm657_vm4, %v565_v27  ;;  %v1038_v31 = vmul.f32 %v1031_v8, %v1027_v30 }
 0x125   : > { %693 = vst.msk [vmem:[#allocation2 + $0x118] sm:$0xff] %vm592_vm3, %v575_v28 }
 0x126   : > { %995 = vrot.lane.b32.xlu1 %v987_v29, %s2399_s28  ;;  %1046 = vrot.lane.b32.xlu0 %v1038_v31, %s2398_s27 }
 0x12a   : > { %v535_v32 = vpop.permute.xlu1 %534  ;;  %v919_v37 = vld [vmem:[#allocation2 + $0x18] sm:$0xff] }
 0x12b   : > { %v594_v33 = vsel %vm592_vm3, %v533_v26, %v535_v32  ;;  %663 = vst.msk [vmem:[#allocation2 + $0x28] sm:$0xff] %vm592_vm3, %v535_v32  ;;  %v571_v34 = vpop.permute.xlu0 %570  ;;  %v545_v35 = vpop.permute.xlu2 %544 }
 0x12c   : > { %v2741_v36 = vsel %vm592_vm3, %v569_v19, %v571_v34  ;;  %690 = vst.msk [vmem:[#allocation2 + $0x100] sm:$0xff] %vm592_vm3, %v571_v34  ;;  %v898_v16 = vld [vmem:[#allocation2 + $0x118] sm:$0xff] }
 0x12d   : > { %670 = vst.msk [vmem:[#allocation2 + $0x60] sm:$0xff] %vm657_vm4, %v545_v35  ;;  %v901_v20 = vmul.f32 %v898_v16, %v2644_v61 }
 0x12e   : > { %927 = vrot.lane.b32.xlu1 %v594_v33, %s2400_s29  ;;  %925 = vrot.lane.b32.xlu0 %v919_v37, %s2400_s29 }
 0x132   : > { %v567_v38 = vpop.permute.xlu1 %566  ;;  %v921_v39 = vld [vmem:[#allocation2 + $0x28] sm:$0xff] }
 0x133   : > { %v2748_v40 = vsel %vm592_vm3, %v565_v27, %v567_v38  ;;  %687 = vst.msk [vmem:[#allocation2 + $0xe8] sm:$0xff] %vm592_vm3, %v567_v38  ;;  %929 = vrot.lane.b32.xlu2 %v921_v39, %s2400_s29  ;;  %v541_v41 = vpop.permute.xlu0 %540  ;;  %v551_v42 = vpop.permute.xlu2 %550 }
 0x134   : > { %667 = vst.msk [vmem:[#allocation2 + $0x48] sm:$0xff] %vm657_vm4, %v541_v41  ;;  %v798_v19 = vld [vmem:[#allocation2 + $0x60] sm:$0xff] }
 0x135   : > { %675 = vst.msk [vmem:[#allocation2 + $0x88] sm:$0xff] %vm592_vm3, %v551_v42  ;;  %v813_v24 = vmul.f32 %v2680_v4, %v798_v19  ;;  %v979_v19 = vld [vmem:[#allocation2 + $0xf0] sm:$0xff] }
 0x136   : > { %1015 = vrot.lane.b32.xlu1 %v1007_v44, %s2400_s29  ;;  %993 = vrot.lane.b32.xlu0 %v986_v45, %s2399_s28 }
 0x13a   : > { %v543_v48 = vpop.permute.xlu1 %542 }
 0x13b   : > { %v596_v49 = vsel %vm592_vm3, %v541_v41, %v543_v48  ;;  %669 = vst.msk [vmem:[#allocation2 + $0x58] sm:$0xff] %vm592_vm3, %v543_v48  ;;  %991 = vrot.lane.b32.xlu2 %v985_v47, %s2399_s28  ;;  %v547_v50 = vpop.permute.xlu0 %546  ;;  %v581_v51 = vpop.permute.xlu2 %580  ;;  %v940_v3 = vld [vmem:[#allocation2 + $0x48] sm:$0xff] }
 0x13c   : > { %v597_v53 = vsel %vm592_vm3, %v545_v35, %v547_v50  ;;  %672 = vst.msk [vmem:[#allocation2 + $0x70] sm:$0xff] %vm592_vm3, %v547_v50  ;;  %v953_v2 = vmul.f32 %v948_v0, %v596_v49  ;;  %v952_v6 = vmul.f32 %v2685_v5, %v940_v3 }
 0x13d   : > { %697 = vst.msk [vmem:[#allocation2 + $0x138] sm:$0xff] %vm657_vm4, %v581_v51  ;;  %v814_v27 = vmul.f32 %v2756_v43, %v597_v53 }
 0x13e   : > { %1013 = vrot.lane.b32.xlu0 %v2721_v13, %s2400_s29 }
 0x142   : > { %v573_v54 = vpop.permute.xlu1 %572  ;;  %v942_v56 = vld [vmem:[#allocation2 + $0x58] sm:$0xff] }
 0x143   : > { %v604_v58 = vsel %vm592_vm3, %v573_v54, %v575_v28  ;;  %691 = vst.msk [vmem:[#allocation2 + $0x108] sm:$0xff] %vm657_vm4, %v573_v54  ;;  %1011 = vrot.lane.b32.xlu2 %v1005_v55, %s2400_s29  ;;  %v577_v59 = vpop.permute.xlu0 %576  ;;  %v587_v60 = vpop.permute.xlu2 %586  ;;  %v954_v63 = vmul.f32 %v2716_v10, %v942_v56  ;;  %v800_v25 = vld [vmem:[#allocation2 + $0x70] sm:$0xff]  ;;  %v862_v28 = vsel %vm861_vm8, %v2699_v7, %v2649_v62 }
 0x144   : > { %694 = vst.msk [vmem:[#allocation2 + $0x120] sm:$0xff] %vm657_vm4, %v577_v59  ;;  %v900_v12 = vmul.f32 %v2783_v9, %v604_v58  ;;  %v815_v26 = vmul.f32 %v2627_v57, %v800_v25  ;;  %v747_v44 = vld [vmem:[#allocation2 + $0x138] sm:$0xff] }
 0x145   : > { %962 = vrot.lane.b32.xlu1 %v954_v63, %s2401_s30  ;;  %702 = vst.msk [vmem:[#allocation2 + $0x160] sm:$0xff] %vm592_vm3, %v587_v60 }
 0x146   : > { %960 = vrot.lane.b32.xlu0 %v953_v2, %s2401_s30 }
 0x14a   : > { %v579_v8 = vpop.permute.xlu1 %578  ;;  %v896_v13 = vld [vmem:[#allocation2 + $0x108] sm:$0xff] }
 0x14b   : > { %v605_v10 = vsel %vm592_vm3, %v577_v59, %v579_v8  ;;  %696 = vst.msk [vmem:[#allocation2 + $0x130] sm:$0xff] %vm592_vm3, %v579_v8  ;;  %958 = vrot.lane.b32.xlu2 %v952_v6, %s2401_s30  ;;  %v583_v11 = vpop.permute.xlu0 %582  ;;  %v557_v15 = vpop.permute.xlu2 %556  ;;  %v899_v5 = vmul.f32 %v896_v13, %v2607_v52  ;;  %v854_v33 = vld [vmem:[#allocation2 + $0x120] sm:$0xff]  ;;  %s188_s30 = sand.u32 1, %s2380_s16  }
 0x14c   : > { %v606_v14 = vsel %vm592_vm3, %v581_v51, %v583_v11  ;;  %699 = vst.msk [vmem:[#allocation2 + $0x148] sm:$0xff] %vm592_vm3, %v583_v11  ;;  %v867_v32 = vmul.f32 %v862_v28, %v605_v10  ;;  %v866_v35 = vmul.f32 %v2699_v7, %v854_v33  ;;  %v836_v47 = vld [vmem:[#allocation2 + $0x160] sm:$0xff] }
 0x14d   : > { %907 = vrot.lane.b32.xlu1 %v900_v12, %s2402_s5  ;;  %679 = vst.msk [vmem:[#allocation2 + $0xa8] sm:$0xff] %vm657_vm4, %v557_v15  ;;  %v981_v10 = vld [vmem:[#allocation2 + $0x100] sm:$0xff] }
 0x14e   : > { %905 = vrot.lane.b32.xlu0 %v899_v5, %s2402_s5 }
 0x152   : > { %v549_v21 = vpop.permute.xlu1 %548  ;;  %v856_v37 = vld [vmem:[#allocation2 + $0x130] sm:$0xff] }
 0x153   : > { %v2796_v22 = vsel %vm592_vm3, %v549_v21, %v551_v42  ;;  %673 = vst.msk [vmem:[#allocation2 + $0x78] sm:$0xff] %vm657_vm4, %v549_v21  ;;  %909 = vrot.lane.b32.xlu2 %v901_v20, %s2402_s5  ;;  %v553_v23 = vpop.permute.xlu0 %552  ;;  %v868_v38 = vmul.f32 %v2649_v62, %v856_v37  ;;  %v749_v45 = vld [vmem:[#allocation2 + $0x148] sm:$0xff] }
 0x154   : > { %676 = vst.msk [vmem:[#allocation2 + $0x90] sm:$0xff] %vm657_vm4, %v553_v23  ;;  %v709_v48 = vld [vmem:[#allocation2 + $0xa8] sm:$0xff] }
 0x155   : > { %819 = vrot.lane.b32.xlu1 %v813_v24, %s2399_s28  ;;  %v726_v49 = vmul.f32 %v2607_v52, %v709_v48 }
 0x156   : > { %823 = vrot.lane.b32.xlu0 %v815_v26, %s2399_s28 }
 0x15a   : > { %v555_v29 = vpop.permute.xlu1 %554 }
 0x15b   : > { %v2809_v30 = vsel %vm592_vm3, %v553_v23, %v555_v29  ;;  %678 = vst.msk [vmem:[#allocation2 + $0xa0] sm:$0xff] %vm592_vm3, %v555_v29  ;;  %821 = vrot.lane.b32.xlu2 %v814_v27, %s2399_s28  ;;  %v559_v31 = vpop.permute.xlu0 %558 }
 0x15c   : > { %v600_v34 = vsel %vm592_vm3, %v557_v15, %v559_v31  ;;  %681 = vst.msk [vmem:[#allocation2 + $0xb8] sm:$0xff] %vm592_vm3, %v559_v31 }
 0x15d   : > { %874 = vrot.lane.b32.xlu1 %v867_v32, %s2403_s6  ;;  %v727_v54 = vmul.f32 %v2783_v9, %v600_v34 }
 0x15e   : > { %872 = vrot.lane.b32.xlu0 %v866_v35, %s2403_s6 }
 0x162   : > { %v585_v39 = vpop.permute.xlu1 %584 }
 0x163   : > { %v607_v41 = vsel %vm592_vm3, %v585_v39, %v587_v60  ;;  %700 = vst.msk [vmem:[#allocation2 + $0x150] sm:$0xff] %vm657_vm4, %v585_v39  ;;  %876 = vrot.lane.b32.xlu2 %v868_v38, %s2403_s6  ;;  %v589_v42 = vpop.permute.xlu0 %588  ;;  %v711_v50 = vld [vmem:[#allocation2 + $0xb8] sm:$0xff]  ;;  %s2189_s6 = sshll.u32 %s188_s30, 8 }
 0x164   : > { %703 = vst.msk [vmem:[#allocation2 + $0x168] sm:$0xff] %vm657_vm4, %v589_v42  ;;  %v728_v51 = vmul.f32 %v2644_v61, %v711_v50  ;;  %s3176_s7 = scalar_lea.vmem [#allocation5], %s2189_s6 }
 0x165   : > { %753 = vrot.lane.b32.xlu1 %v747_v44, %s2391_s13 }
 0x166   : > { %757 = vrot.lane.b32.xlu0 %v749_v45, %s2391_s13 }
 0x16a   : > { %v834_v7 = vld [vmem:[#allocation2 + $0x150] sm:$0xff]  ;;  %v591_v46 = vpop.permute.xlu1 %590 }
 0x16b   : > { %755 = vrot.lane.b32.xlu2 %v606_v14, %s2391_s13  ;;  %v608_v62 = vsel %vm592_vm3, %v589_v42, %v591_v46  ;;  %v767_v53 = vld [vmem:[#allocation2 + $0x168] sm:$0xff]  ;;  %v893_v46 = vld [vmem:[#allocation2 + $0xd8] sm:$0xff] }
 0x16c   : > { %v769_v55 = vmul.f32 %v767_v53, %v2535_v18  ;;  %v770_v56 = vmul.f32 %v2533_v17, %v608_v62  ;;  %v895_v42 = vld [vmem:[#allocation2 + $0xe8] sm:$0xff] }
 0x16d   : > { %840 = vrot.lane.b32.xlu1 %v834_v7, %s2391_s13 }
 0x16e   : > { %844 = vrot.lane.b32.xlu0 %v836_v47, %s2391_s13 }
 0x173   : > { %842 = vrot.lane.b32.xlu2 %v607_v41, %s2391_s13 }
 0x175   : > { %732 = vrot.lane.b32.xlu1 %v726_v49, %s2402_s5 }
 0x176   : > { %736 = vrot.lane.b32.xlu0 %v728_v51, %s2402_s5 }
 0x179   : > { %v1045_v58 = vpop.permute.xlu2 %1044 }
 0x17b   : > { %734 = vrot.lane.b32.xlu2 %v727_v54, %s2402_s5 }
 0x17d   : > { %773 = vrot.lane.b32.xlu1 %v769_v55, %s2396_s23 }
 0x183   : > { %775 = vrot.lane.b32.xlu2 %v770_v56, %s2396_s23 }
 0x18d   : > { %v930_v59 = vpop.permute.xlu2 %929 }
 0x190   : > { %v1043_v60 = vpop.permute.xlu1 %1042 }
 0x191   : > { %v1049_v29 = vsel %vm1048_vm10, %v1043_v60, %v1045_v58 }
 0x195   : > { %v992_v63 = vpop.permute.xlu2 %991 }
 0x198   : > { %v996_v0 = vpop.permute.xlu1 %995  ;;  %v1047_v2 = vpop.permute.xlu0 %1046 }
 0x199   : > { %v1004_v11 = vadd.f32 %v996_v0, %v981_v10  ;;  %v1050_v31 = vsel %vm1048_vm10, %v1045_v58, %v1047_v2 }
 0x19d   : > { %v1012_v3 = vpop.permute.xlu2 %1011 }
 0x1a0   : > { %v928_v6 = vpop.permute.xlu1 %927  ;;  %v926_v8 = vpop.permute.xlu0 %925 }
 0x1a1   : > { %v932_v50 = vsel %vm931_vm11, %v926_v8, %v928_v6  ;;  %v933_v53 = vsel %vm931_vm11, %v928_v6, %v930_v59 }
 0x1a5   : > { %v959_v12 = vpop.permute.xlu2 %958 }
 0x1a8   : > { %v1016_v18 = vpop.permute.xlu1 %1015  ;;  %v994_v14 = vpop.permute.xlu0 %993 }
 0x1a9   : > { %v1024_v13 = vadd.f32 %v1016_v18, %v1004_v11  ;;  %v997_v5 = vsel %vm825_vm9, %v992_v63, %v994_v14  ;;  %v998_v16 = vsel %vm825_vm9, %v994_v14, %v996_v0 }
 0x1aa   : > { %v1002_v20 = vadd.f32 %v997_v5, %v979_v19  ;;  %v1003_v21 = vadd.f32 %v998_v16, %v2741_v36  ;;  %v795_v19 = vld [vmem:[#allocation2 + $0x90] sm:$0xff] }
 0x1ab   : > { %v1056_v15 = vadd.f32 %v1047_v2, %v1024_v13 }
 0x1ad   : > { %v1059_v17 = vadd.f32 %v1056_v15, %v2666_v1  ;;  %v910_v24 = vpop.permute.xlu2 %909 }
 0x1af   : > { %1062 = vst.msk [vmem:[#allocation3 + $0x58] sm:$0xff] %vm592_vm3, %v1059_v17 }
 0x1b0   : > { %v1014_v23 = vpop.permute.xlu0 %1013 }
 0x1b1   : > { %v1017_v25 = vsel %vm931_vm11, %v1012_v3, %v1014_v23  ;;  %v1018_v26 = vsel %vm931_vm11, %v1014_v23, %v1016_v18 }
 0x1b2   : > { %v1022_v27 = vadd.f32 %v1017_v25, %v1002_v20  ;;  %v1023_v28 = vadd.f32 %v1018_v26, %v1003_v21  ;;  %v797_v26 = vld [vmem:[#allocation2 + $0xa0] sm:$0xff] }
 0x1b4   : > { %v1054_v32 = vadd.f32 %v1049_v29, %v1022_v27  ;;  %v1055_v33 = vadd.f32 %v1050_v31, %v1023_v28 }
 0x1b5   : > { %v822_v39 = vpop.permute.xlu2 %821 }
 0x1b6   : > { %v2846_v34 = vld [vmem:[#allocation3 + $0x58] sm:$0xff]  ;;  %v1057_v36 = vadd.f32 %v1054_v32, %v2666_v1  ;;  %v2852_v37 = vadd.f32 %v1055_v33, %v2666_v1 }
 0x1b7   : > { %v963_v35 = vpop.permute.xlu1 %962  ;;  %1285 = vrot.lane.b32.xlu0 %v2846_v34, %s2398_s27 }
 0x1b8   : > { %1060 = vst.msk [vmem:[#allocation3 + $0x48] sm:$0xff] %vm657_vm4, %v1057_v36  ;;  %v961_v38 = vpop.permute.xlu0 %960  ;;  %1283 = vrot.lane.b32.xlu2 %v2852_v37, %s2398_s27 }
 0x1b9   : > { %v965_v56 = vsel %vm964_vm13, %v959_v12, %v961_v38  ;;  %v966_v60 = vsel %vm964_vm13, %v961_v38, %v963_v35 }
 0x1bd   : > { %v877_v63 = vpop.permute.xlu2 %876 }
 0x1bf   : > { %v908_v41 = vpop.permute.xlu1 %907  ;;  %v2858_v7 = vld [vmem:[#allocation3 + $0x48] sm:$0xff] }
 0x1c0   : > { %v912_v44 = vsel %vm738_vm12, %v908_v41, %v910_v24  ;;  %v906_v62 = vpop.permute.xlu0 %905  ;;  %1281 = vrot.lane.b32.xlu1 %v2858_v7, %s2398_s27 }
 0x1c1   : > { %v918_v45 = vadd.f32 %v912_v44, %v895_v42  ;;  %v911_v48 = vsel %vm738_vm12, %v906_v62, %v908_v41  ;;  %v916_v49 = vadd.f32 %v906_v62, %v893_v46  ;;  %v1264_v44 = vmul.f32 0.25, %v2852_v37 }
 0x1c2   : > { %v917_v51 = vadd.f32 %v911_v48, %v2748_v40 }
 0x1c3   : > { %v939_v47 = vadd.f32 %v930_v59, %v918_v45  ;;  %v937_v55 = vadd.f32 %v932_v50, %v916_v49  ;;  %v2895_v45 = vmul.f32 0.75, %v2852_v37 }
 0x1c4   : > { %v938_v58 = vadd.f32 %v933_v53, %v917_v51  ;;  %v706_v53 = vld [vmem:[#allocation2 + $0x78] sm:$0xff] }
 0x1c5   : > { %v972_v54 = vadd.f32 %v963_v35, %v939_v47  ;;  %v970_v2 = vadd.f32 %v965_v56, %v937_v55  ;;  %v756_v18 = vpop.permute.xlu2 %755 }
 0x1c6   : > { %v971_v10 = vadd.f32 %v966_v60, %v938_v58  ;;  %v708_v58 = vld [vmem:[#allocation2 + $0x88] sm:$0xff] }
 0x1c7   : > { %v975_v0 = vadd.f32 %v972_v54, %v2666_v1  ;;  %v820_v3 = vpop.permute.xlu1 %819  ;;  %v973_v11 = vadd.f32 %v970_v2, %v2666_v1  ;;  %v2916_v2 = vmul.f32 0.75, %v2858_v7 }
 0x1c8   : > { %v2870_v8 = vadd.f32 %v971_v10, %v2666_v1  ;;  %v824_v40 = vpop.permute.xlu0 %823  ;;  %v826_v17 = vsel %vm825_vm9, %v820_v3, %v822_v39 }
 0x1c9   : > { %978 = vst.msk [vmem:[#allocation3 + $0x40] sm:$0xff] %vm592_vm3, %v975_v0  ;;  %v827_v16 = vsel %vm825_vm9, %v822_v39, %v824_v40  ;;  %v831_v20 = vadd.f32 %v826_v17, %v795_v19  ;;  %v833_v28 = vadd.f32 %v824_v40, %v797_v26  ;;  %v1263_v0 = vmul.f32 0.25, %v2858_v7 }
 0x1ca   : > { %976 = vst.msk [vmem:[#allocation3 + $0x30] sm:$0xff] %vm657_vm4, %v973_v11  ;;  %1150 = vrot.lane.b32.xlu1 %v2870_v8, %s2398_s27  ;;  %v832_v21 = vadd.f32 %v827_v16, %v2809_v30  ;;  %v2935_v26 = vmul.f32 0.75, %v2846_v34 }
 0x1cd   : > { %v843_v5 = vpop.permute.xlu2 %842 }
 0x1cf   : > { %v875_v59 = vpop.permute.xlu1 %874 }
 0x1d0   : > { %v2875_v6 = vld [vmem:[#allocation3 + $0x40] sm:$0xff]  ;;  %v873_v12 = vpop.permute.xlu0 %872  ;;  %v880_v39 = vsel %vm878_vm14, %v875_v59, %v877_v63 }
 0x1d1   : > { %1152 = vrot.lane.b32.xlu2 %v2875_v6, %s2398_s27  ;;  %v2879_v13 = vld [vmem:[#allocation3 + $0x30] sm:$0xff]  ;;  %v879_v29 = vsel %vm878_vm14, %v873_v12, %v875_v59 }
 0x1d2   : > { %1148 = vrot.lane.b32.xlu0 %v2879_v13, %s2398_s27 }
 0x1d5   : > { %v735_v41 = vpop.permute.xlu2 %734 }
 0x1d7   : > { %v754_v14 = vpop.permute.xlu1 %753 }
 0x1d8   : > { %v758_v15 = vpop.permute.xlu0 %757  ;;  %v759_v11 = vsel %vm721_vm7, %v754_v14, %v756_v18 }
 0x1d9   : > { %v760_v3 = vsel %vm721_vm7, %v756_v18, %v758_v15 }
 0x1df   : > { %v841_v23 = vpop.permute.xlu1 %840 }
 0x1e0   : > { %v846_v24 = vsel %vm721_vm7, %v841_v23, %v843_v5  ;;  %v851_v25 = vadd.f32 %v841_v23, %v831_v20  ;;  %v845_v32 = vpop.permute.xlu0 %844 }
 0x1e1   : > { %v852_v27 = vadd.f32 %v846_v24, %v832_v21  ;;  %v847_v35 = vsel %vm721_vm7, %v843_v5, %v845_v32  ;;  %v1265_v21 = vmul.f32 0.25, %v2846_v34 }
 0x1e2   : > { %v884_v31 = vadd.f32 %v873_v12, %v851_v25  ;;  %v853_v38 = vadd.f32 %v847_v35, %v833_v28  ;;  %v776_v12 = vpop.permute.xlu2 %775  ;;  %v1126_v35 = vmul.f32 0.25, %v2870_v8 }
 0x1e3   : > { %v885_v33 = vadd.f32 %v879_v29, %v852_v27 }
 0x1e4   : > { %v887_v36 = vadd.f32 %v884_v31, %v2666_v1  ;;  %v886_v42 = vadd.f32 %v880_v39, %v853_v38 }
 0x1e5   : > { %v2890_v30 = vadd.f32 %v885_v33, %v2666_v1 }
 0x1e6   : > { %890 = vst.msk [vmem:[#allocation3 + $0x18] sm:$0xff] %vm657_vm4, %v887_v36  ;;  %v889_v48 = vadd.f32 %v886_v42, %v2666_v1  ;;  %v2955_v36 = vmul.f32 0.75, %v2870_v8 }
 0x1e7   : > { %v733_v46 = vpop.permute.xlu1 %732  ;;  %1220 = vrot.lane.b32.xlu0 %v2890_v30, %s2398_s27  ;;  %v2900_v62 = vmul.f32 0.75, %v2890_v30  ;;  %v1270_v47 = vmul.f32 0.25, %v2890_v30 }
 0x1e8   : > { %v739_v49 = vsel %vm738_vm12, %v733_v46, %v735_v41  ;;  %892 = vst.msk [vmem:[#allocation3 + $0x28] sm:$0xff] %vm592_vm3, %v889_v48  ;;  %v737_v54 = vpop.permute.xlu0 %736  ;;  %v744_v55 = vadd.f32 %v733_v46, %v706_v53  ;;  %v2976_v46 = vmul.f32 0.75, %v2875_v6  ;;  %v1125_v53 = vmul.f32 0.25, %v2879_v13 }
 0x1e9   : > { %v2906_v50 = vadd.f32 %v1264_v44, %v2900_v62  ;;  %v2909_v51 = vadd.f32 %v2895_v45, %v1270_v47  ;;  %v745_v56 = vadd.f32 %v739_v49, %v2796_v22  ;;  %v740_v60 = vsel %vm738_vm12, %v735_v41, %v737_v54 }
 0x1ea   : > { %v746_v63 = vadd.f32 %v740_v60, %v708_v58  ;;  %v764_v17 = vadd.f32 %v754_v14, %v744_v55  ;;  %v1127_v44 = vmul.f32 0.25, %v2875_v6  ;;  %v2988_v54 = vmul.f32 0.75, %v2879_v13 }
 0x1eb   : > { %v765_v16 = vadd.f32 %v759_v11, %v745_v56 }
 0x1ec   : > { %v766_v40 = vadd.f32 %v760_v3, %v746_v63 }
 0x1ed   : > { %v2919_v10 = vld [vmem:[#allocation3 + $0x18] sm:$0xff] }
 0x1ee   : > { %1218 = vrot.lane.b32.xlu2 %v2919_v10, %s2398_s27  ;;  %v2925_v22 = vmul.f32 0.75, %v2919_v10  ;;  %v1269_v59 = vmul.f32 0.25, %v2919_v10  ;;  %v783_v19 = vadd.f32 %v776_v12, %v766_v40 }
 0x1ef   : > { %v774_v5 = vpop.permute.xlu1 %773  ;;  %v2932_v25 = vld [vmem:[#allocation3 + $0x28] sm:$0xff] }
 0x1f0   : > { %v1266_v15 = vadd.f32 %v1263_v0, %v2925_v22  ;;  %v1275_v20 = vadd.f32 %v2916_v2, %v1269_v59  ;;  %v777_v18 = vsel %vm592_vm3, %v774_v5, %v776_v12  ;;  %v781_v23 = vadd.f32 %v774_v5, %v764_v17  ;;  %1222 = vrot.lane.b32.xlu1 %v2932_v25, %s2398_s27 }
 0x1f1   : > { %v782_v24 = vadd.f32 %v777_v18, %v765_v16  ;;  %v791_v14 = vadd.f32 %v2666_v1, %v783_v19  ;;  %v2942_v27 = vmul.f32 0.75, %v2932_v25  ;;  %v1271_v28 = vmul.f32 0.25, %v2932_v25 }
 0x1f2   : > { %1329 = vst.msk [vmem:[#allocation4 + $0x48] sm:$0xff] %vm657_vm4, %v1266_v15  ;;  %v789_v29 = vadd.f32 %v2666_v1, %v781_v23 }
 0x1f3   : > { %1332 = vst.msk [vmem:[#allocation4 + $0x78] sm:$0xff] %vm657_vm4, %v1275_v20  ;;  %v2948_v31 = vadd.f32 %v2666_v1, %v782_v24  ;;  %v1268_v32 = vadd.f32 %v1265_v21, %v2942_v27  ;;  %v1277_v33 = vadd.f32 %v2935_v26, %v1271_v28 }
 0x1f4   : > { %794 = vst.msk [vmem:[#allocation3 + $0x10] sm:$0xff] %vm592_vm3, %v791_v14 }
 0x1f5   : > { %792 = vst.msk [vmem:[#allocation3] sm:$0xff] %vm657_vm4, %v789_v29  ;;  %v2959_v38 = vmul.f32 0.75, %v2948_v31  ;;  %v1132_v39 = vmul.f32 0.25, %v2948_v31 }
 0x1f6   : > { %1082 = vrot.lane.b32.xlu2 %v2948_v31, %s2398_s27  ;;  %1331 = vst.msk [vmem:[#allocation4 + $0x58] sm:$0xff] %vm592_vm3, %v1268_v32 }
 0x1f7   : > { %v2966_v1 = vadd.f32 %v1126_v35, %v2959_v38  ;;  %v2969_v41 = vadd.f32 %v2955_v36, %v1132_v39  ;;  %1334 = vst.msk [vmem:[#allocation4 + $0x88] sm:$0xff] %vm592_vm3, %v1277_v33 }
 0x1f9   : > { %v3008_v11 = vld [vmem:[#allocation4 + $0x48] sm:$0xff] }
 0x1fa   : > { %v2996_v58 = vld [vmem:[#allocation4 + $0x78] sm:$0xff]  ;;  %v1600_v19 = vmul.f32 0.25, %v3008_v11  ;;  %v3061_v29 = vmul.f32 0.75, %v3008_v11 }
 0x1fb   : > { %v2972_v42 = vld [vmem:[#allocation3 + $0x10] sm:$0xff]  ;;  %v1790_v14 = vmul.f32 0.25, %v2996_v58 }
 0x1fc   : > { %1084 = vrot.lane.b32.xlu0 %v2972_v42, %s2398_s27  ;;  %v2981_v47 = vmul.f32 0.75, %v2972_v42  ;;  %v1133_v48 = vmul.f32 0.25, %v2972_v42  ;;  %v2984_v49 = vld [vmem:[#allocation3] sm:$0xff] }
 0x1fd   : > { %v2991_v55 = vmul.f32 0.75, %v2984_v49  ;;  %v1131_v56 = vmul.f32 0.25, %v2984_v49  ;;  %1080 = vrot.lane.b32.xlu1 %v2984_v49, %s2398_s27  ;;  %v3014_v40 = vld [vmem:[#allocation4 + $0x58] sm:$0xff] }
 0x1fe   : > { %v1130_v60 = vadd.f32 %v1127_v44, %v2981_v47  ;;  %v1139_v63 = vadd.f32 %v2976_v46, %v1133_v48  ;;  %1808 = vrot.lane.b32.xlu2 %v2996_v58, %s2398_s27  ;;  %v3020_v59 = vld [vmem:[#allocation4 + $0x88] sm:$0xff]  ;;  %v3074_v48 = vmul.f32 0.75, %v2969_v41 }
 0x1ff   : > { %v1128_v0 = vadd.f32 %v1125_v53, %v2991_v55  ;;  %v1137_v3 = vadd.f32 %v2988_v54, %v1131_v56  ;;  %v1792_v23 = vmul.f32 0.25, %v3020_v59  ;;  %v3071_v44 = vmul.f32 0.75, %v3020_v59 }
 0x200   : > { %1199 = vst.msk [vmem:[#allocation4 + $0x40] sm:$0xff] %vm592_vm3, %v1130_v60  ;;  %v3077_v53 = vmul.f32 0.75, %v2996_v58  ;;  %v1791_v60 = vmul.f32 0.25, %v2909_v51 }
 0x201   : > { %1202 = vst.msk [vmem:[#allocation4 + $0x70] sm:$0xff] %vm592_vm3, %v1139_v63 }
 0x202   : > { %1197 = vst.msk [vmem:[#allocation4 + $0x30] sm:$0xff] %vm657_vm4, %v1128_v0  ;;  %v1794_v0 = vadd.f32 %v1791_v60, %v3074_v48 }
 0x203   : > { %1200 = vst.msk [vmem:[#allocation4 + $0x60] sm:$0xff] %vm657_vm4, %v1137_v3  ;;  %v3086_v3 = vmul.f32 0.75, %v2966_v1 }
 0x204   : > { %1618 = vrot.lane.b32.xlu0 %v3008_v11, %s2398_s27  ;;  %3647 = vst [vmem:[#allocation11_spill] sm:$0xff] %v3071_v44 }
 0x205   : > { %1620 = vrot.lane.b32.xlu1 %v2906_v50, %s2398_s27  ;;  %3648 = vst [vmem:[#allocation12_spill] sm:$0xff] %v3074_v48 }
 0x206   : > { %1622 = vrot.lane.b32.xlu2 %v3014_v40, %s2398_s27  ;;  %3649 = vst [vmem:[#allocation13_spill] sm:$0xff] %v3077_v53 }
 0x207   : > { %v3028_v17 = vld [vmem:[#allocation4 + $0x40] sm:$0xff]  ;;  %3650 = vst [vmem:[#allocation14_spill] sm:$0xff] %v3086_v3 }
 0x208   : > { %v3042_v15 = vld [vmem:[#allocation4 + $0x70] sm:$0xff]  ;;  %v1608_v60 = vmul.f32 0.25, %v3028_v17 }
 0x209   : > { %v3032_v5 = vld [vmem:[#allocation4 + $0x30] sm:$0xff]  ;;  %v3050_v18 = vmul.f32 0.75, %v3042_v15  ;;  %v1798_v35 = vmul.f32 0.25, %v3042_v15 }
 0x20a   : > { %v3024_v12 = vld [vmem:[#allocation4 + $0x60] sm:$0xff]  ;;  %v3039_v16 = vmul.f32 0.75, %v3032_v5  ;;  %v1606_v24 = vmul.f32 0.25, %v3032_v5 }
 0x20b   : > { %3645 = vst [vmem:[#allocation9_spill] sm:$0xff] %v3050_v18  ;;  %v3054_v21 = vmul.f32 0.75, %v3024_v12  ;;  %v1795_v28 = vadd.f32 %v1792_v23, %v3050_v18  ;;  %v1796_v39 = vmul.f32 0.25, %v3024_v12  ;;  %v1804_v56 = vadd.f32 %v3071_v44, %v1798_v35  ;;  %v2192_v35 = vld [vmem:[%s3629_s3 + $0x1] ss:$4 sm:$0x3] }
 0x20c   : > { %1810 = vrot.lane.b32.xlu0 %v2909_v51, %s2398_s27  ;;  %3644 = vst [vmem:[#allocation8_spill] sm:$0xff] %v3039_v16  ;;  %v1603_v20 = vadd.f32 %v1600_v19, %v3039_v16  ;;  %v1612_v33 = vadd.f32 %v3061_v29, %v1606_v24  ;;  %v3090_v19 = vmul.f32 0.75, %v3028_v17  ;;  %v1797_v23 = vmul.f32 0.25, %v2969_v41 }
 0x20d   : > { %1812 = vrot.lane.b32.xlu1 %v3020_v59, %s2398_s27  ;;  %3646 = vst [vmem:[#allocation10_spill] sm:$0xff] %v3054_v21  ;;  %v1793_v32 = vadd.f32 %v1790_v14, %v3054_v21  ;;  %v1802_v63 = vadd.f32 %v3077_v53, %v1796_v39  ;;  %v1602_v24 = vmul.f32 0.25, %v3014_v40  ;;  %v1141_v53 = vperm.slane %v2192_v35, 0 }
 0x20e   : > { %1745 = vrot.lane.b32.xlu2 %v3024_v12, %s2398_s27  ;;  %3651 = vst [vmem:[#allocation15_spill] sm:$0xff] %v3090_v19 }
 0x214   : > { %1559 = vrot.lane.b32.xlu0 %v3028_v17, %s2398_s27 }
 0x215   : > { %1555 = vrot.lane.b32.xlu1 %v3032_v5, %s2398_s27 }
 0x216   : > { %1557 = vrot.lane.b32.xlu2 %v2966_v1, %s2398_s27 }
 0x21c   : > { %1747 = vrot.lane.b32.xlu0 %v2969_v41, %s2398_s27 }
 0x21d   : > { %1749 = vrot.lane.b32.xlu1 %v3042_v15, %s2398_s27 }
 0x21e   : > { %1682 = vrot.lane.b32.xlu2 %v1603_v20, %s2398_s27  ;;  %v1601_v20 = vmul.f32 0.25, %v2906_v50 }
 0x220   : > { %v1604_v14 = vadd.f32 %v1601_v20, %v3086_v3  ;;  %v3110_v20 = vmul.f32 0.75, %v2906_v50 }
 0x224   : > { %1876 = vrot.lane.b32.xlu0 %v1795_v28, %s2398_s27  ;;  %v3097_v28 = vmul.f32 0.75, %v2909_v51 }
 0x225   : > { %1872 = vrot.lane.b32.xlu1 %v1793_v32, %s2398_s27  ;;  %v1605_v32 = vadd.f32 %v1602_v24, %v3090_v19  ;;  %v3114_v24 = vmul.f32 0.75, %v3014_v40 }
 0x226   : > { %1698 = vrot.lane.b32.xlu2 %v1612_v33, %s2398_s27  ;;  %3652 = vst [vmem:[#allocation16_spill] sm:$0xff] %v3097_v28  ;;  %v1803_v33 = vadd.f32 %v3097_v28, %v1797_v23 }
 0x229   : > { %v1286_v39 = vpop.permute.xlu0 %1285 }
 0x22c   : > { %1892 = vrot.lane.b32.xlu0 %v1804_v56, %s2398_s27  ;;  %v1607_v56 = vmul.f32 0.25, %v2966_v1 }
 0x22d   : > { %1888 = vrot.lane.b32.xlu1 %v1802_v63, %s2398_s27  ;;  %v1284_v63 = vpop.permute.xlu2 %1283 }
 0x22e   : > { %1874 = vrot.lane.b32.xlu2 %v1794_v0, %s2398_s27  ;;  %v1142_v0 = vperm.slane %v2192_v35, 1  ;;  %v1288_v23 = vsel %vm1048_vm10, %v1284_v63, %v1286_v39 }
 0x230   : > { %v1292_v44 = vmul.f32 %v1288_v23, %v1142_v0 }
 0x234   : > { %1684 = vrot.lane.b32.xlu0 %v1604_v14, %s2398_s27  ;;  %v1613_v14 = vadd.f32 %v3110_v20, %v1607_v56 }
 0x235   : > { %1686 = vrot.lane.b32.xlu1 %v1605_v32, %s2398_s27  ;;  %v1614_v32 = vadd.f32 %v3114_v24, %v1608_v60  ;;  %v1153_v28 = vpop.permute.xlu2 %1152 }
 0x236   : > { %1890 = vrot.lane.b32.xlu2 %v1803_v33, %s2398_s27  ;;  %v1282_v33 = vpop.permute.xlu1 %1281 }
 0x237   : > { %v1287_v48 = vsel %vm1048_vm10, %v1282_v33, %v1284_v63 }
 0x238   : > { %v1291_v39 = vmul.f32 %v1287_v48, %v1141_v53 }
 0x23c   : > { %1700 = vrot.lane.b32.xlu0 %v1613_v14, %s2398_s27 }
 0x23d   : > { %1702 = vrot.lane.b32.xlu1 %v1614_v32, %s2398_s27 }
 0x23e   : > { %1297 = vrot.lane.b32.xlu2 %v1292_v44, %s2404_s9  ;;  %v1151_v19 = vpop.permute.xlu1 %1150  ;;  %v281_v44 = vld [vmem:[%s3629_s3] ss:$4 sm:$0x3] }
 0x23f   : > { %v1155_v60 = vsel %vm1048_vm10, %v1151_v19, %v1153_v28  ;;  %v1073_v35 = vperm.slane %v281_v44, 0 }
 0x240   : > { %v1159_v14 = vmul.f32 %v1155_v60, %v1142_v0 }
 0x244   : > { %v1149_v18 = vpop.permute.xlu0 %1148 }
 0x245   : > { %1295 = vrot.lane.b32.xlu1 %v1291_v39, %s2404_s9  ;;  %v1154_v56 = vsel %vm1048_vm10, %v1149_v18, %v1151_v19 }
 0x246   : > { %v1158_v3 = vmul.f32 %v1154_v56, %v1141_v53  ;;  %v1074_v53 = vperm.slane %v281_v44, 1  ;;  %v2324_v44 = vld [vmem:[%s3629_s3 + $0x3] ss:$4 sm:$0x3] }
 0x248   : > { %v1219_v23 = vpop.permute.xlu2 %1218  ;;  %1162 = vrot.lane.b32.xlu0 %v1158_v3, %s2404_s9 }
 0x24d   : > { %1164 = vrot.lane.b32.xlu1 %v1159_v14, %s2404_s9  ;;  %s2108_s9 = scalar_lea.sflag [#allocation6], %s188_s30 }
 0x250   : > { %v1083_v32 = vpop.permute.xlu2 %1082 }
 0x258   : > { %v1809_v63 = vpop.permute.xlu2 %1808 }
 0x259   : > { %v1221_v48 = vpop.permute.xlu0 %1220 }
 0x25a   : > { %v1224_v33 = vsel %vm1048_vm10, %v1219_v23, %v1221_v48 }
 0x25b   : > { %v1228_v39 = vmul.f32 %v1224_v33, %v1073_v35 }
 0x25d   : > { %1232 = vrot.lane.b32.xlu2 %v1228_v39, %s2402_s5  ;;  %v3139_v39 = vperm.slane %v2324_v44, 1 }
 0x25f   : > { %3653 = vst [vmem:[#allocation17_spill] sm:$0xff] %v3139_v39 }
 0x260   : > { %v1623_v18 = vpop.permute.xlu2 %1622 }
 0x262   : > { %v1223_v19 = vpop.permute.xlu1 %1222 }
 0x263   : > { %v1225_v3 = vsel %vm1048_vm10, %v1221_v48, %v1223_v19  ;;  %v3137_v48 = vperm.slane %v2324_v44, 0 }
 0x264   : > { %v1229_v28 = vmul.f32 %v1225_v3, %v1074_v53 }
 0x266   : > { %1234 = vrot.lane.b32.xlu0 %v1229_v28, %s2402_s5 }
 0x268   : > { %v1746_v0 = vpop.permute.xlu2 %1745 }
 0x26e   : > { %v1085_v56 = vpop.permute.xlu0 %1084 }
 0x26f   : > { %v1087_v60 = vsel %vm1048_vm10, %v1083_v32, %v1085_v56  ;;  %v1081_v14 = vpop.permute.xlu1 %1080 }
 0x270   : > { %v1091_v21 = vmul.f32 %v1087_v60, %v1074_v53  ;;  %v1086_v16 = vsel %vm1048_vm10, %v1081_v14, %v1083_v32  ;;  %v1558_v23 = vpop.permute.xlu2 %1557 }
 0x271   : > { %v1090_v33 = vmul.f32 %v1086_v16, %v1073_v35 }
 0x272   : > { %1096 = vrot.lane.b32.xlu2 %v1091_v21, %s2402_s5 }
 0x273   : > { %1094 = vrot.lane.b32.xlu1 %v1090_v33, %s2402_s5 }
 0x276   : > { %v1619_v19 = vpop.permute.xlu0 %1618 }
 0x277   : > { %v1621_v3 = vpop.permute.xlu1 %1620 }
 0x278   : > { %v1624_v53 = vsel %vm1048_vm10, %v1619_v19, %v1621_v3  ;;  %v1625_v32 = vsel %vm1048_vm10, %v1621_v3, %v1623_v18  ;;  %v1683_v28 = vpop.permute.xlu2 %1682  ;;  %v2325_v19 = vld [vmem:[%s3629_s3 + $0x2] ss:$4 sm:$0x3] }
 0x279   : > { %v1628_v16 = vmul.f32 %v1624_v53, %v3137_v48  ;;  %v1629_v21 = vmul.f32 %v1625_v32, %v3139_v39  ;;  %v3156_v3 = vperm.slane %v2325_v19, 1 }
 0x27b   : > { %1632 = vrot.lane.b32.xlu0 %v1628_v16, %s2392_s14  ;;  %1634 = vrot.lane.b32.xlu1 %v1629_v21, %s2392_s14 }
 0x27e   : > { %v1811_v35 = vpop.permute.xlu0 %1810 }
 0x27f   : > { %v1814_v56 = vsel %vm1048_vm10, %v1809_v63, %v1811_v35  ;;  %v1813_v60 = vpop.permute.xlu1 %1812  ;;  %v3158_v63 = vperm.slane %v2325_v19, 0 }
 0x280   : > { %v1818_v14 = vmul.f32 %v1814_v56, %v3137_v48  ;;  %v1815_v33 = vsel %vm1048_vm10, %v1811_v35, %v1813_v60  ;;  %v1699_v44 = vpop.permute.xlu2 %1698 }
 0x281   : > { %v1819_v18 = vmul.f32 %v1815_v33, %v3139_v39 }
 0x283   : > { %1824 = vrot.lane.b32.xlu2 %v1819_v18, %s2392_s14  ;;  %1822 = vrot.lane.b32.xlu1 %v1818_v14, %s2392_s14 }
 0x286   : > { %v1560_v53 = vpop.permute.xlu0 %1559 }
 0x287   : > { %v1562_v32 = vsel %vm1048_vm10, %v1558_v23, %v1560_v53  ;;  %v1556_v16 = vpop.permute.xlu1 %1555 }
 0x288   : > { %v1566_v21 = vmul.f32 %v1562_v32, %v3156_v3  ;;  %v1561_v35 = vsel %vm1048_vm10, %v1556_v16, %v1558_v23  ;;  %v1875_v56 = vpop.permute.xlu2 %1874 }
 0x289   : > { %v1565_v60 = vmul.f32 %v1561_v35, %v3158_v63 }
 0x28b   : > { %1571 = vrot.lane.b32.xlu2 %v1566_v21, %s2391_s13  ;;  %1569 = vrot.lane.b32.xlu1 %v1565_v60, %s2391_s13 }
 0x28e   : > { %v1748_v14 = vpop.permute.xlu0 %1747 }
 0x28f   : > { %v1751_v33 = vsel %vm1048_vm10, %v1746_v0, %v1748_v14  ;;  %v1750_v18 = vpop.permute.xlu1 %1749 }
 0x290   : > { %v1755_v19 = vmul.f32 %v1751_v33, %v3158_v63  ;;  %v1752_v53 = vsel %vm1048_vm10, %v1748_v14, %v1750_v18  ;;  %v1891_v39 = vpop.permute.xlu2 %1890 }
 0x291   : > { %v1756_v32 = vmul.f32 %v1752_v53, %v3156_v3 }
 0x293   : > { %1761 = vrot.lane.b32.xlu0 %v1756_v32, %s2391_s13  ;;  %1759 = vrot.lane.b32.xlu2 %v1755_v19, %s2391_s13 }
 0x296   : > { %v1877_v23 = vpop.permute.xlu0 %1876 }
 0x297   : > { %v1879_v16 = vsel %vm1048_vm10, %v1875_v56, %v1877_v23  ;;  %v1873_v21 = vpop.permute.xlu1 %1872 }
 0x298   : > { %2246 = vst [vmem:[%s3176_s7 + $0x98] sm:$0xff] %v1879_v16  ;;  %v1878_v0 = vsel %vm1048_vm10, %v1873_v21, %v1875_v56  ;;  %v1298_v35 = vpop.permute.xlu2 %1297 }
 0x299   : > { %2245 = vst [vmem:[%s3176_s7 + $0x90] sm:$0xff] %v1878_v0  ;;  %v1305_v60 = vadd.f32 %v1298_v35, %v2932_v25 }
 0x29b   : > { %v1308_v14 = vmul.f32 0.25, %v1305_v60 }
 0x29d   : > { %1316 = vrot.lane.b32.xlu2 %v1308_v14, %s2400_s29 }
 0x29e   : > { %v1893_v33 = vpop.permute.xlu0 %1892 }
 0x29f   : > { %v1895_v18 = vsel %vm1048_vm10, %v1891_v39, %v1893_v33  ;;  %v1889_v19 = vpop.permute.xlu1 %1888 }
 0x2a0   : > { %2248 = vst [vmem:[%s3176_s7 + $0xa8] sm:$0xff] %v1895_v18  ;;  %v1894_v53 = vsel %vm1048_vm10, %v1889_v19, %v1891_v39 }
 0x2a1   : > { %2247 = vst [vmem:[%s3176_s7 + $0xa0] sm:$0xff] %v1894_v53 }
 0x2a6   : > { %v1685_v32 = vpop.permute.xlu0 %1684 }
 0x2a7   : > { %v1688_v56 = vsel %vm1048_vm10, %v1683_v28, %v1685_v32  ;;  %v1687_v23 = vpop.permute.xlu1 %1686 }
 0x2a8   : > { %2237 = vst [vmem:[%s3176_s7 + $0x50] sm:$0xff] %v1688_v56  ;;  %v1689_v25 = vsel %vm1048_vm10, %v1685_v32, %v1687_v23 }
 0x2a9   : > { %2238 = vst [vmem:[%s3176_s7 + $0x58] sm:$0xff] %v1689_v25 }
 0x2ae   : > { %v1701_v16 = vpop.permute.xlu0 %1700 }
 0x2af   : > { %v1704_v21 = vsel %vm1048_vm10, %v1699_v44, %v1701_v16  ;;  %v1703_v0 = vpop.permute.xlu1 %1702 }
 0x2b0   : > { %2239 = vst [vmem:[%s3176_s7 + $0x60] sm:$0xff] %v1704_v21  ;;  %v1705_v60 = vsel %vm1048_vm10, %v1701_v16, %v1703_v0 }
 0x2b1   : > { %2240 = vst [vmem:[%s3176_s7 + $0x68] sm:$0xff] %v1705_v60 }
 0x2b7   : > { %v1296_v14 = vpop.permute.xlu1 %1295  ;;  %v1233_v16 = vpop.permute.xlu2 %1232 }
 0x2b8   : > { %v1299_v39 = vsel %vm1166_vm15, %v1296_v14, %v1298_v35  ;;  %v1303_v33 = vadd.f32 %v1296_v14, %v2919_v10 }
 0x2b9   : > { %v1304_v28 = vadd.f32 %v1299_v39, %v2890_v30 }
 0x2ba   : > { %v1306_v18 = vmul.f32 0.25, %v1303_v33  ;;  %v1163_v53 = vpop.permute.xlu0 %1162 }
 0x2bb   : > { %v1307_v19 = vmul.f32 0.25, %v1304_v28  ;;  %v1171_v32 = vadd.f32 %v1163_v53, %v2984_v49  ;;  %v1240_v49 = vadd.f32 %v1233_v16, %v2858_v7 }
 0x2bc   : > { %1312 = vrot.lane.b32.xlu0 %v1306_v18, %s2400_s29 }
 0x2bd   : > { %1314 = vrot.lane.b32.xlu1 %v1307_v19, %s2400_s29  ;;  %v1174_v44 = vmul.f32 0.25, %v1171_v32  ;;  %v1243_v21 = vmul.f32 0.25, %v1240_v49 }
 0x2bf   : > { %v1165_v56 = vpop.permute.xlu1 %1164  ;;  %1180 = vrot.lane.b32.xlu2 %v1174_v44, %s2400_s29 }
 0x2c0   : > { %v1167_v23 = vsel %vm1166_vm15, %v1163_v53, %v1165_v56  ;;  %v1173_v25 = vadd.f32 %v1165_v56, %v2972_v42 }
 0x2c1   : > { %v1172_v10 = vadd.f32 %v1167_v23, %v2948_v31  ;;  %v1738_v23 = vmul.f32 %v3042_v15, %v2627_v57 }
 0x2c2   : > { %v1176_v35 = vmul.f32 0.25, %v1173_v25  ;;  %v1546_v25 = vmul.f32 %v3032_v5, %v2680_v4  ;;  %v1736_v5 = vmul.f32 %v3024_v12, %v2680_v4  ;;  %v1545_v12 = vmul.f32 %v3014_v40, %v2644_v61 }
 0x2c3   : > { %v1175_v30 = vmul.f32 0.25, %v1172_v10 }
 0x2c5   : > { %1182 = vrot.lane.b32.xlu0 %v1175_v30, %s2400_s29  ;;  %1184 = vrot.lane.b32.xlu1 %v1176_v35, %s2400_s29 }
 0x2cc   : > { %v1097_v0 = vpop.permute.xlu2 %1096 }
 0x2cd   : > { %1249 = vrot.lane.b32.xlu1 %v1243_v21, %s2391_s13  ;;  %v1104_v7 = vadd.f32 %v1097_v0, %v2875_v6 }
 0x2cf   : > { %v1107_v53 = vmul.f32 0.25, %v1104_v7 }
 0x2d8   : > { %v1235_v60 = vpop.permute.xlu0 %1234 }
 0x2d9   : > { %v1236_v42 = vsel %vm738_vm12, %v1233_v16, %v1235_v60  ;;  %v1242_v14 = vadd.f32 %v1235_v60, %v2846_v34  ;;  %v1547_v60 = vmul.f32 %v2966_v1, %v2756_v43 }
 0x2da   : > { %v1241_v31 = vadd.f32 %v1236_v42, %v2852_v37  ;;  %v1737_v42 = vmul.f32 %v2969_v41, %v2756_v43  ;;  %v1733_v41 = vmul.f32 %v2996_v58, %v2607_v52  ;;  %v1544_v58 = vmul.f32 %v2906_v50, %v2783_v9 }
 0x2db   : > { %v1245_v39 = vmul.f32 0.25, %v1242_v14 }
 0x2dc   : > { %v1244_v28 = vmul.f32 0.25, %v1241_v31 }
 0x2dd   : > { %v1825_v33 = vpop.permute.xlu2 %1824  ;;  %1253 = vrot.lane.b32.xlu0 %v1245_v39, %s2391_s13 }
 0x2de   : > { %1251 = vrot.lane.b32.xlu2 %v1244_v28, %s2391_s13  ;;  %v1832_v6 = vadd.f32 %v1825_v33, %v1738_v23 }
 0x2e0   : > { %v1835_v49 = vmul.f32 0.25, %v1832_v6 }
 0x2e5   : > { %v1095_v18 = vpop.permute.xlu1 %1094  ;;  %v1572_v19 = vpop.permute.xlu2 %1571 }
 0x2e6   : > { %v1098_v32 = vsel %vm738_vm12, %v1095_v18, %v1097_v0  ;;  %v1102_v44 = vadd.f32 %v1095_v18, %v2879_v13  ;;  %1115 = vrot.lane.b32.xlu2 %v1107_v53, %s2391_s13  ;;  %v1548_v13 = vmul.f32 %v3028_v17, %v2627_v57 }
 0x2e7   : > { %v1103_v34 = vadd.f32 %v1098_v32, %v2870_v8 }
 0x2e8   : > { %v1105_v56 = vmul.f32 0.25, %v1102_v44  ;;  %v1579_v44 = vadd.f32 %v1572_v19, %v1545_v12 }
 0x2e9   : > { %v1106_v37 = vmul.f32 0.25, %v1103_v34 }
 0x2ea   : > { %1111 = vrot.lane.b32.xlu0 %v1105_v56, %s2391_s13  ;;  %v1582_v23 = vmul.f32 0.25, %v1579_v44 }
 0x2eb   : > { %1113 = vrot.lane.b32.xlu1 %v1106_v37, %s2391_s13 }
 0x2ed   : > { %v1633_v10 = vpop.permute.xlu0 %1632  ;;  %v1635_v8 = vpop.permute.xlu1 %1634 }
 0x2ee   : > { %v1640_v35 = vadd.f32 %v1633_v10, %v1546_v25  ;;  %v1642_v30 = vadd.f32 %v1635_v8, %v1548_v13  ;;  %v1760_v16 = vpop.permute.xlu2 %1759  ;;  %v1636_v15 = vsel %vm808_vm5, %v1633_v10, %v1635_v8  ;;  %v1734_v13 = vmul.f32 %v2909_v51, %v2783_v9 }
 0x2ef   : > { %v1641_v17 = vadd.f32 %v1636_v15, %v1547_v60 }
 0x2f0   : > { %v1643_v21 = vmul.f32 0.25, %v1640_v35  ;;  %v1645_v0 = vmul.f32 0.25, %v1642_v30 }
 0x2f1   : > { %v1644_v1 = vmul.f32 0.25, %v1641_v17 }
 0x2f2   : > { %1649 = vrot.lane.b32.xlu2 %v1643_v21, %s2399_s28  ;;  %1843 = vrot.lane.b32.xlu0 %v1835_v49, %s2399_s28 }
 0x2f3   : > { %1653 = vrot.lane.b32.xlu1 %v1645_v0, %s2399_s28 }
 0x2f5   : > { %v1823_v14 = vpop.permute.xlu1 %1822 }
 0x2f6   : > { %v1826_v31 = vsel %vm808_vm5, %v1823_v14, %v1825_v33  ;;  %v1830_v39 = vadd.f32 %v1823_v14, %v1736_v5  ;;  %v1543_v33 = vmul.f32 %v3008_v11, %v2607_v52  ;;  %v1735_v11 = vmul.f32 %v3020_v59, %v2644_v61 }
 0x2f7   : > { %v1831_v28 = vadd.f32 %v1826_v31, %v1737_v42  ;;  %v1317_v7 = vpop.permute.xlu2 %1316 }
 0x2f8   : > { %v1833_v18 = vmul.f32 0.25, %v1830_v39  ;;  %v1325_v53 = vadd.f32 %v1317_v7, %v2935_v26  ;;  %v1767_v26 = vadd.f32 %v1760_v16, %v1733_v41 }
 0x2f9   : > { %v1834_v32 = vmul.f32 0.25, %v1831_v28 }
 0x2fa   : > { %1651 = vrot.lane.b32.xlu0 %v1644_v1, %s2399_s28  ;;  %1337 = vst.msk [vmem:[#allocation4 + $0xb8] sm:$0xff] %vm592_vm3, %v1325_v53  ;;  %v1770_v6 = vmul.f32 0.25, %v1767_v26 }
 0x2fb   : > { %1839 = vrot.lane.b32.xlu1 %v1833_v18, %s2399_s28  ;;  %1841 = vrot.lane.b32.xlu2 %v1834_v32, %s2399_s28 }
 0x2fd   : > { %v1570_v34 = vpop.permute.xlu1 %1569 }
 0x2fe   : > { %v1577_v56 = vadd.f32 %v1570_v34, %v1543_v33  ;;  %v1573_v25 = vsel %vm721_vm7, %v1570_v34, %v1572_v19 }
 0x2ff   : > { %v1578_v40 = vadd.f32 %v1573_v25, %v1544_v58 }
 0x300   : > { %v1580_v37 = vmul.f32 0.25, %v1577_v56 }
 0x301   : > { %v1581_v49 = vmul.f32 0.25, %v1578_v40  ;;  %v3261_v50 = vld [vmem:[#allocation4 + $0xb8] sm:$0xff] }
 0x302   : > { %1586 = vrot.lane.b32.xlu0 %v1580_v37, %s2402_s5  ;;  %v1982_v41 = vmul.f32 0.25, %v3261_v50 }
 0x303   : > { %1590 = vrot.lane.b32.xlu2 %v1582_v23, %s2402_s5  ;;  %1776 = vrot.lane.b32.xlu1 %v1770_v6, %s2402_s5 }
 0x305   : > { %v1762_v10 = vpop.permute.xlu0 %1761 }
 0x306   : > { %v1763_v8 = vsel %vm721_vm7, %v1760_v16, %v1762_v10  ;;  %v1769_v19 = vadd.f32 %v1762_v10, %v1735_v11 }
 0x307   : > { %v1768_v35 = vadd.f32 %v1763_v8, %v1734_v13 }
 0x308   : > { %v1772_v30 = vmul.f32 0.25, %v1769_v19 }
 0x309   : > { %v1771_v21 = vmul.f32 0.25, %v1768_v35 }
 0x30a   : > { %1780 = vrot.lane.b32.xlu0 %v1772_v30, %s2402_s5 }
 0x30b   : > { %1588 = vrot.lane.b32.xlu1 %v1581_v49, %s2402_s5  ;;  %1778 = vrot.lane.b32.xlu2 %v1771_v21, %s2402_s5 }
 0x313   : > { %2002 = vrot.lane.b32.xlu1 %v3261_v50, %s2398_s27 }
 0x319   : > { %v1181_v17 = vpop.permute.xlu2 %1180 }
 0x32e   : > { %v1313_v51 = vpop.permute.xlu0 %1312 }
 0x32f   : > { %v1315_v59 = vpop.permute.xlu1 %1314 }
 0x330   : > { %v1318_v16 = vsel %vm931_vm11, %v1313_v51, %v1315_v59  ;;  %v1319_v0 = vsel %vm931_vm11, %v1315_v59, %v1317_v7 }
 0x331   : > { %v1323_v15 = vadd.f32 %v1318_v16, %v2916_v2  ;;  %v3269_v60 = vadd.f32 %v1319_v0, %v2895_v45 }
 0x333   : > { %1335 = vst.msk [vmem:[#allocation4 + $0xa8] sm:$0xff] %vm657_vm4, %v1323_v15  ;;  %2000 = vrot.lane.b32.xlu0 %v3269_v60, %s2398_s27  ;;  %v1981_v7 = vmul.f32 0.25, %v3269_v60 }
 0x337   : > { %v1183_v5 = vpop.permute.xlu0 %1182  ;;  %v1185_v42 = vpop.permute.xlu1 %1184 }
 0x338   : > { %v1186_v14 = vsel %vm931_vm11, %v1181_v17, %v1183_v5  ;;  %v1187_v31 = vsel %vm931_vm11, %v1183_v5, %v1185_v42  ;;  %v1193_v39 = vadd.f32 %v1185_v42, %v2976_v46  ;;  %v1252_v46 = vpop.permute.xlu2 %1251 }
 0x339   : > { %v1191_v28 = vadd.f32 %v1186_v14, %v2988_v54  ;;  %v3279_v2 = vadd.f32 %v1187_v31, %v2955_v36 }
 0x33a   : > { %1205 = vst.msk [vmem:[#allocation4 + $0xa0] sm:$0xff] %vm592_vm3, %v1193_v39  ;;  %v3282_v45 = vld [vmem:[#allocation4 + $0xa8] sm:$0xff] }
 0x33b   : > { %1203 = vst.msk [vmem:[#allocation4 + $0x90] sm:$0xff] %vm657_vm4, %v1191_v28  ;;  %1998 = vrot.lane.b32.xlu2 %v3282_v45, %s2398_s27  ;;  %v3289_v1 = vmul.f32 0.75, %v3279_v2  ;;  %1937 = vrot.lane.b32.xlu0 %v3279_v2, %s2398_s27  ;;  %v1980_v26 = vmul.f32 0.25, %v3282_v45 }
 0x33d   : > { %v3294_v36 = vadd.f32 %v1981_v7, %v3289_v1 }
 0x33f   : > { %v1250_v54 = vpop.permute.xlu1 %1249 }
 0x340   : > { %v1255_v18 = vsel %vm721_vm7, %v1250_v54, %v1252_v46  ;;  %v1260_v53 = vadd.f32 %v1250_v54, %v2925_v22  ;;  %v1116_v25 = vpop.permute.xlu2 %1115 }
 0x341   : > { %v3299_v32 = vadd.f32 %v1255_v18, %v2900_v62  ;;  %v3301_v12 = vld [vmem:[#allocation4 + $0xa0] sm:$0xff] }
 0x342   : > { %1326 = vst.msk [vmem:[#allocation4 + $0x18] sm:$0xff] %vm657_vm4, %v1260_v53  ;;  %v3306_v33 = vmul.f32 0.75, %v3301_v12  ;;  %1939 = vrot.lane.b32.xlu1 %v3301_v12, %s2398_s27  ;;  %v3310_v44 = vld [vmem:[#allocation4 + $0x90] sm:$0xff]  ;;  %v3654_v18 = vld [vmem:[#allocation8_spill] sm:$0xff] }
 0x343   : > { %1935 = vrot.lane.b32.xlu2 %v3310_v44, %s2398_s27  ;;  %v3316_v62 = vmul.f32 0.75, %v3310_v44  ;;  %1431 = vrot.lane.b32.xlu0 %v3299_v32, %s2398_s27 }
 0x344   : > { %v3321_v22 = vadd.f32 %v1982_v41, %v3306_v33 }
 0x345   : > { %v3324_v34 = vadd.f32 %v1980_v26, %v3316_v62 }
 0x349   : > { %v3326_v56 = vld [vmem:[#allocation4 + $0x18] sm:$0xff] }
 0x34a   : > { %v3383_v31 = vmul.f32 0.75, %v3326_v56 }
 0x34b   : > { %1429 = vrot.lane.b32.xlu2 %v3326_v56, %s2398_s27 }
 0x34c   : > { %v1650_v35 = vpop.permute.xlu2 %1649 }
 0x34f   : > { %v1254_v37 = vpop.permute.xlu0 %1253 }
 0x350   : > { %v1256_v23 = vsel %vm721_vm7, %v1252_v46, %v1254_v37 }
 0x351   : > { %v1262_v6 = vadd.f32 %v1256_v23, %v2942_v27  ;;  %v1407_v23 = vmul.f32 0.25, %v3299_v32 }
 0x353   : > { %1328 = vst.msk [vmem:[#allocation4 + $0x28] sm:$0xff] %vm592_vm3, %v1262_v6  ;;  %v3655_v6 = vld [vmem:[#allocation10_spill] sm:$0xff] }
 0x355   : > { %v3350_v51 = vpop.permute.xlu2 %1841 }
 0x35a   : > { %v3333_v11 = vld [vmem:[#allocation4 + $0x28] sm:$0xff] }
 0x35b   : > { %1433 = vrot.lane.b32.xlu1 %v3333_v11, %s2398_s27  ;;  %v1408_v39 = vmul.f32 0.25, %v3333_v11  ;;  %v3397_v37 = vmul.f32 0.75, %v3333_v11 }
 0x35c   : > { %v1112_v58 = vpop.permute.xlu0 %1111 }
 0x35d   : > { %v1122_v40 = vadd.f32 %v1112_v58, %v2991_v55  ;;  %v1114_v13 = vpop.permute.xlu1 %1113 }
 0x35e   : > { %v1117_v10 = vsel %vm721_vm7, %v1112_v58, %v1114_v13  ;;  %v1118_v8 = vsel %vm721_vm7, %v1114_v13, %v1116_v25  ;;  %v1591_v13 = vpop.permute.xlu2 %1590 }
 0x35f   : > { %1194 = vst.msk [vmem:[#allocation4] sm:$0xff] %vm657_vm4, %v1122_v40  ;;  %v3342_v27 = vadd.f32 %v1117_v10, %v2959_v38  ;;  %v1124_v19 = vadd.f32 %v1118_v8, %v2981_v47 }
 0x361   : > { %1196 = vst.msk [vmem:[#allocation4 + $0x10] sm:$0xff] %vm592_vm3, %v1124_v19  ;;  %v3394_v26 = vmul.f32 0.75, %v3342_v27  ;;  %v1413_v8 = vmul.f32 0.25, %v3342_v27 }
 0x363   : > { %v1410_v40 = vadd.f32 %v1407_v23, %v3394_v26 }
 0x364   : > { %v3346_v30 = vpop.permute.xlu0 %1843 }
 0x365   : > { %v1654_v55 = vpop.permute.xlu1 %1653 }
 0x366   : > { %v1662_v49 = vadd.f32 %v1654_v55, %v3114_v24  ;;  %v3360_v17 = vld [vmem:[#allocation4] sm:$0xff] }
 0x367   : > { %v3367_v24 = vmul.f32 0.75, %v3360_v17  ;;  %v1412_v14 = vmul.f32 0.25, %v3360_v17 }
 0x368   : > { %1718 = vrot.lane.b32.xlu1 %v1662_v49, %s2398_s27  ;;  %v3371_v5 = vld [vmem:[#allocation4 + $0x10] sm:$0xff] }
 0x369   : > { %v3379_v42 = vmul.f32 0.75, %v3371_v5  ;;  %v1418_v46 = vadd.f32 %v3383_v31, %v1412_v14  ;;  %v1414_v41 = vmul.f32 0.25, %v3371_v5  ;;  %v3656_v49 = vld [vmem:[#allocation14_spill] sm:$0xff]  ;;  %v3658_v14 = vld [vmem:[#allocation9_spill] sm:$0xff] }
 0x36b   : > { %v1411_v54 = vadd.f32 %v1408_v39, %v3379_v42  ;;  %v1420_v58 = vadd.f32 %v3397_v37, %v1414_v41 }
 0x36c   : > { %v1652_v21 = vpop.permute.xlu0 %1651 }
 0x36d   : > { %v1655_v59 = vsel %vm825_vm9, %v1650_v35, %v1652_v21  ;;  %v1656_v38 = vsel %vm825_vm9, %v1652_v21, %v1654_v55  ;;  %v1840_v16 = vpop.permute.xlu1 %1839  ;;  %v3410_v55 = vmul.f32 0.75, %v3299_v32 }
 0x36e   : > { %v1660_v47 = vadd.f32 %v1655_v59, %v3061_v29  ;;  %v1661_v0 = vadd.f32 %v1656_v38, %v3110_v20  ;;  %v3358_v15 = vsel %vm825_vm9, %v1840_v16, %v3350_v51  ;;  %v1406_v29 = vmul.f32 0.25, %v3326_v56  ;;  %v3657_v59 = vld [vmem:[#allocation15_spill] sm:$0xff] }
 0x36f   : > { %v1419_v16 = vadd.f32 %v3410_v55, %v1413_v8 }
 0x370   : > { %1363 = vrot.lane.b32.xlu1 %v3342_v27, %s2398_s27  ;;  %1716 = vrot.lane.b32.xlu0 %v1661_v0, %s2398_s27  ;;  %v1409_v20 = vadd.f32 %v1406_v29, %v3367_v24  ;;  %v1779_v0 = vpop.permute.xlu2 %1778 }
 0x371   : > { %1714 = vrot.lane.b32.xlu2 %v1660_v47, %s2398_s27 }
 0x374   : > { %v1587_v28 = vpop.permute.xlu0 %1586 }
 0x375   : > { %v1777_v7 = vpop.permute.xlu1 %1776  ;;  %v1597_v53 = vadd.f32 %v1587_v28, %v3654_v18 }
 0x376   : > { %v1787_v25 = vadd.f32 %v1777_v7, %v3655_v6 }
 0x378   : > { %1492 = vrot.lane.b32.xlu1 %v1409_v20, %s2398_s27  ;;  %1361 = vrot.lane.b32.xlu0 %v3360_v17, %s2398_s27  ;;  %v1782_v20 = vsel %vm738_vm12, %v1777_v7, %v1779_v0 }
 0x379   : > { %1365 = vrot.lane.b32.xlu2 %v3371_v5, %s2398_s27 }
 0x37c   : > { %v1781_v47 = vpop.permute.xlu0 %1780 }
 0x37d   : > { %v1589_v10 = vpop.permute.xlu1 %1588  ;;  %v1783_v29 = vsel %vm738_vm12, %v1779_v0, %v1781_v47  ;;  %v3661_v47 = vld [vmem:[#allocation16_spill] sm:$0xff] }
 0x37e   : > { %v1592_v19 = vsel %vm738_vm12, %v1587_v28, %v1589_v10  ;;  %v1593_v35 = vsel %vm738_vm12, %v1589_v10, %v1591_v13  ;;  %v1789_v39 = vadd.f32 %v1783_v29, %v3658_v14  ;;  %v3659_v28 = vld [vmem:[#allocation12_spill] sm:$0xff] }
 0x37f   : > { %v1598_v21 = vadd.f32 %v1592_v19, %v3656_v49  ;;  %v1599_v38 = vadd.f32 %v1593_v35, %v3657_v59 }
 0x380   : > { %1508 = vrot.lane.b32.xlu1 %v1418_v46, %s2398_s27  ;;  %1496 = vrot.lane.b32.xlu0 %v1411_v54, %s2398_s27  ;;  %v1788_v46 = vadd.f32 %v1782_v20, %v3659_v28 }
 0x381   : > { %1666 = vrot.lane.b32.xlu2 %v1597_v53, %s2398_s27 }
 0x385   : > { %v2003_v18 = vpop.permute.xlu1 %2002 }
 0x388   : > { %1856 = vrot.lane.b32.xlu1 %v1787_v25, %s2398_s27  ;;  %1512 = vrot.lane.b32.xlu0 %v1420_v58, %s2398_s27  ;;  %v3660_v25 = vld [vmem:[#allocation17_spill] sm:$0xff] }
 0x389   : > { %1494 = vrot.lane.b32.xlu2 %v1410_v40, %s2398_s27 }
 0x390   : > { %1668 = vrot.lane.b32.xlu0 %v1598_v21, %s2398_s27  ;;  %1670 = vrot.lane.b32.xlu1 %v1599_v38, %s2398_s27 }
 0x391   : > { %1510 = vrot.lane.b32.xlu2 %v1419_v16, %s2398_s27  ;;  %v1846_v16 = vsel %vm825_vm9, %v3350_v51, %v3346_v30 }
 0x392   : > { %v1851_v0 = vadd.f32 %v1846_v16, %v3661_v47 }
 0x395   : > { %v1999_v54 = vpop.permute.xlu2 %1998 }
 0x398   : > { %1860 = vrot.lane.b32.xlu0 %v1789_v39, %s2398_s27 }
 0x399   : > { %1858 = vrot.lane.b32.xlu2 %v1788_v46, %s2398_s27 }
 0x39d   : > { %v1936_v7 = vpop.permute.xlu2 %1935 }
 0x3a5   : > { %v2001_v53 = vpop.permute.xlu0 %2000  ;;  %v1430_v19 = vpop.permute.xlu2 %1429 }
 0x3a6   : > { %v2004_v41 = vsel %vm1048_vm10, %v1999_v54, %v2001_v53  ;;  %v2005_v23 = vsel %vm1048_vm10, %v2001_v53, %v2003_v18 }
 0x3a7   : > { %v2008_v6 = vmul.f32 %v2004_v41, %v3137_v48  ;;  %v2009_v58 = vmul.f32 %v2005_v23, %v3660_v25 }
 0x3a9   : > { %2014 = vrot.lane.b32.xlu0 %v2009_v58, %s2392_s14  ;;  %2012 = vrot.lane.b32.xlu2 %v2008_v6, %s2392_s14 }
 0x3ad   : > { %v1938_v40 = vpop.permute.xlu0 %1937 }
 0x3ae   : > { %v1941_v13 = vsel %vm1048_vm10, %v1936_v7, %v1938_v40 }
 0x3af   : > { %v1945_v10 = vmul.f32 %v1941_v13, %v3158_v63  ;;  %v3662_v13 = vld [vmem:[#allocation13_spill] sm:$0xff] }
 0x3b1   : > { %1949 = vrot.lane.b32.xlu0 %v1945_v10, %s2391_s13  ;;  %v1850_v10 = vadd.f32 %v3358_v15, %v3662_v13 }
 0x3b4   : > { %v1940_v8 = vpop.permute.xlu1 %1939 }
 0x3b5   : > { %v1942_v35 = vsel %vm1048_vm10, %v1938_v40, %v1940_v8  ;;  %v1432_v49 = vpop.permute.xlu0 %1431 }
 0x3b6   : > { %v1946_v21 = vmul.f32 %v1942_v35, %v3156_v3  ;;  %v1435_v59 = vsel %vm1048_vm10, %v1430_v19, %v1432_v49 }
 0x3b7   : > { %v1439_v38 = vmul.f32 %v1435_v59, %v3137_v48  ;;  %v3663_v59 = vld [vmem:[#allocation11_spill] sm:$0xff] }
 0x3b8   : > { %1951 = vrot.lane.b32.xlu1 %v1946_v21, %s2391_s13 }
 0x3b9   : > { %1443 = vrot.lane.b32.xlu2 %v1439_v38, %s2392_s14  ;;  %v1852_v38 = vadd.f32 %v3346_v30, %v3663_v59  ;;  %v1926_v30 = vmul.f32 %v3310_v44, %v2680_v4  ;;  %v1924_v59 = vmul.f32 %v3269_v60, %v2783_v9 }
 0x3c1   : > { %1906 = vrot.lane.b32.xlu2 %v1851_v0, %s2398_s27 }
 0x3cb   : > { %v1715_v29 = vpop.permute.xlu2 %1714 }
 0x3cd   : > { %v1434_v20 = vpop.permute.xlu1 %1433 }
 0x3ce   : > { %v1436_v14 = vsel %vm1048_vm10, %v1432_v49, %v1434_v20 }
 0x3cf   : > { %v1440_v48 = vmul.f32 %v1436_v14, %v3660_v25 }
 0x3d1   : > { %1445 = vrot.lane.b32.xlu0 %v1440_v48, %s2392_s14  ;;  %s2265_s14 = sshll.u32 %s2452_s19, 8 }
 0x3d2   : > { %s2119_s29 = scalar_lea.hbm %s3630_s4, %s2265_s14 }
 0x3d3   : > { %v1366_v39 = vpop.permute.xlu2 %1365  ;;  %s2122_s8 = sshll.u32 %s2119_s29, 4  ;;  %s2123_s8 = int_to_ptr.hbm [resolvable:$true] %s2122_s8 }
 0x3d4   : > { %s2340_s19 = sshra.s32 %s2123_s8, 4  ;;  %s2341_s19 = int_to_ptr.hbm [resolvable:$true] %s2340_s19 }
 0x3d5   : > { %s2342_s10 = scalar_lea.hbm %s2341_s19, 256  ;;  %p2347_p0 = scmp.lt.s32.totalorder %s2341_s19, %s3630_s4 }
 0x3d6   : > { %p2343_p11 = scmp.ne.s32.totalorder %s2341_s19, %s2342_s10  ;;  %p2348_p1 = scmp.lt.s32.totalorder %s2346_s20, %s2342_s10 }
 0x3d8   : > { %p2344_p12 = pnand %p2343_p11, %p2469_p5  ;;  %p2349_p2 = por %p2348_p1, %p2347_p0 }
 0x3da   : > { %v1719_v28 = vpop.permute.xlu1 %1718  ;;  %p2345_p13 = pneg %p2344_p12 }
 0x3db   : > { %v1667_v46 = vpop.permute.xlu2 %1666 }
 0x3dc   : > { %p2350_p3 = pnand %p2349_p2, %p2345_p13 }
 0x3e2   : > { %v1364_v54 = vpop.permute.xlu1 %1363  ;;  %v1717_v51 = vpop.permute.xlu0 %1716 }
 0x3e3   : > { %v1368_v18 = vsel %vm1048_vm10, %v1364_v54, %v1366_v39  ;;  %v1720_v53 = vsel %vm1048_vm10, %v1715_v29, %v1717_v51  ;;  %v1721_v41 = vsel %vm1048_vm10, %v1717_v51, %v1719_v28  ;;  %v1495_v6 = vpop.permute.xlu2 %1494 }
 0x3e4   : > { %v1372_v23 = vmul.f32 %v1368_v18, %v3156_v3  ;;  %2241 = vst [vmem:[%s3176_s7 + $0x70] sm:$0xff] %v1720_v53  ;;  %v1928_v53 = vmul.f32 %v3301_v12, %v2627_v57 }
 0x3e5   : > { %2242 = vst [vmem:[%s3176_s7 + $0x78] sm:$0xff] %v1721_v41  ;;  %v1927_v41 = vmul.f32 %v3279_v2, %v2756_v43 }
 0x3e6   : > { %1377 = vrot.lane.b32.xlu1 %v1372_v23, %s2391_s13 }
 0x3ea   : > { %v1493_v25 = vpop.permute.xlu1 %1492  ;;  %v1362_v58 = vpop.permute.xlu0 %1361 }
 0x3eb   : > { %v1498_v7 = vsel %vm1048_vm10, %v1493_v25, %v1495_v6  ;;  %v1367_v40 = vsel %vm1048_vm10, %v1362_v58, %v1364_v54  ;;  %v1511_v3 = vpop.permute.xlu2 %1510 }
 0x3ec   : > { %2229 = vst [vmem:[%s3176_s7 + $0x10] sm:$0xff] %v1498_v7  ;;  %v1371_v8 = vmul.f32 %v1367_v40, %v3158_v63  ;;  %v1923_v40 = vmul.f32 %v3282_v45, %v2607_v52 }
 0x3ee   : > { %1375 = vrot.lane.b32.xlu0 %v1371_v8, %s2391_s13  ;;  %1904 = vrot.lane.b32.xlu1 %v1850_v10, %s2398_s27 }
 0x3f2   : > { %v1509_v19 = vpop.permute.xlu1 %1508  ;;  %v1497_v35 = vpop.permute.xlu0 %1496 }
 0x3f3   : > { %v1514_v49 = vsel %vm1048_vm10, %v1509_v19, %v1511_v3  ;;  %v1499_v21 = vsel %vm1048_vm10, %v1495_v6, %v1497_v35  ;;  %v1859_v63 = vpop.permute.xlu2 %1858  ;;  %v1347_v19 = vmul.f32 %v3360_v17, %v2680_v4  ;;  %v1925_v35 = vmul.f32 %v3261_v50, %v2644_v61 }
 0x3f4   : > { %2231 = vst [vmem:[%s3176_s7 + $0x20] sm:$0xff] %v1514_v49  ;;  %v1349_v4 = vmul.f32 %v3371_v5, %v2627_v57  ;;  %v1348_v17 = vmul.f32 %v3342_v27, %v2756_v43  ;;  %v1344_v27 = vmul.f32 %v3326_v56, %v2607_v52  ;;  %v1986_v52 = vmul.f32 0.25, %v3310_v44 }
 0x3f5   : > { %2230 = vst [vmem:[%s3176_s7 + $0x18] sm:$0xff] %v1499_v21  ;;  %v1990_v44 = vmul.f32 0.75, %v3269_v60 }
 0x3f6   : > { %1908 = vrot.lane.b32.xlu0 %v1852_v38, %s2398_s27 }
 0x3fa   : > { %v1857_v15 = vpop.permute.xlu1 %1856  ;;  %v1513_v16 = vpop.permute.xlu0 %1512 }
 0x3fb   : > { %v1862_v47 = vsel %vm1048_vm10, %v1857_v15, %v1859_v63  ;;  %v1515_v0 = vsel %vm1048_vm10, %v1511_v3, %v1513_v16 }
 0x3fc   : > { %2243 = vst [vmem:[%s3176_s7 + $0x80] sm:$0xff] %v1862_v47 }
 0x3fd   : > { %2232 = vst [vmem:[%s3176_s7 + $0x28] sm:$0xff] %v1515_v0 }
 0x402   : > { %v1669_v29 = vpop.permute.xlu0 %1668  ;;  %v1671_v20 = vpop.permute.xlu1 %1670 }
 0x403   : > { %v1672_v14 = vsel %vm1048_vm10, %v1667_v46, %v1669_v29  ;;  %v1673_v48 = vsel %vm1048_vm10, %v1669_v29, %v1671_v20  ;;  %v2013_v39 = vpop.permute.xlu2 %2012 }
 0x404   : > { %2235 = vst [vmem:[%s3176_s7 + $0x40] sm:$0xff] %v1672_v14  ;;  %v2020_v28 = vadd.f32 %v2013_v39, %v1926_v30 }
 0x405   : > { %2236 = vst [vmem:[%s3176_s7 + $0x48] sm:$0xff] %v1673_v48 }
 0x406   : > { %v2023_v54 = vmul.f32 0.25, %v2020_v28  ;;  %v1346_v28 = vmul.f32 %v3333_v11, %v2644_v61 }
 0x408   : > { %2029 = vrot.lane.b32.xlu1 %v2023_v54, %s2399_s28 }
 0x40a   : > { %v1861_v51 = vpop.permute.xlu0 %1860 }
 0x40b   : > { %v1863_v18 = vsel %vm1048_vm10, %v1859_v63, %v1861_v51  ;;  %v1345_v51 = vmul.f32 %v3299_v32, %v2783_v9  ;;  %v1989_v32 = vmul.f32 0.75, %v3282_v45  ;;  %v1991_v45 = vmul.f32 0.75, %v3261_v50 }
 0x40c   : > { %2244 = vst [vmem:[%s3176_s7 + $0x88] sm:$0xff] %v1863_v18 }
 0x413   : > { %v1444_v3 = vpop.permute.xlu2 %1443 }
 0x414   : > { %v1451_v49 = vadd.f32 %v1444_v3, %v1347_v19 }
 0x416   : > { %v1454_v47 = vmul.f32 0.25, %v1451_v49 }
 0x41b   : > { %v2015_v46 = vpop.permute.xlu0 %2014  ;;  %v1907_v43 = vpop.permute.xlu2 %1906 }
 0x41c   : > { %v2016_v23 = vsel %vm808_vm5, %v2013_v39, %v2015_v46  ;;  %v2022_v6 = vadd.f32 %v2015_v46, %v1928_v53 }
 0x41d   : > { %v2021_v25 = vadd.f32 %v2016_v23, %v1927_v41 }
 0x41e   : > { %v2025_v58 = vmul.f32 0.25, %v2022_v6 }
 0x41f   : > { %v2024_v7 = vmul.f32 0.25, %v2021_v25  ;;  %v1992_v25 = vadd.f32 %v1989_v32, %v1986_v52 }
 0x420   : > { %2033 = vrot.lane.b32.xlu0 %v2025_v58, %s2399_s28  ;;  %v1988_v58 = vmul.f32 0.25, %v3301_v12 }
 0x421   : > { %2031 = vrot.lane.b32.xlu2 %v2024_v7, %s2399_s28 }
 0x423   : > { %v1950_v13 = vpop.permute.xlu0 %1949 }
 0x424   : > { %v1957_v10 = vadd.f32 %v1950_v13, %v1923_v40  ;;  %v1994_v40 = vadd.f32 %v1991_v45, %v1988_v58 }
 0x426   : > { %v1960_v8 = vmul.f32 0.25, %v1957_v10 }
 0x428   : > { %1966 = vrot.lane.b32.xlu1 %v1960_v8, %s2402_s5 }
 0x42a   : > { %v1952_v21 = vpop.permute.xlu1 %1951 }
 0x42b   : > { %v1959_v38 = vadd.f32 %v1952_v21, %v1925_v35  ;;  %v1953_v63 = vsel %vm721_vm7, %v1950_v13, %v1952_v21 }
 0x42c   : > { %v1958_v15 = vadd.f32 %v1953_v63, %v1924_v59 }
 0x42d   : > { %v1962_v16 = vmul.f32 0.25, %v1959_v38 }
 0x42e   : > { %v1961_v0 = vmul.f32 0.25, %v1958_v15 }
 0x42f   : > { %1970 = vrot.lane.b32.xlu0 %v1962_v16, %s2402_s5 }
 0x430   : > { %1968 = vrot.lane.b32.xlu2 %v1961_v0, %s2402_s5  ;;  %1460 = vrot.lane.b32.xlu1 %v1454_v47, %s2399_s28 }
 0x443   : > { %v1446_v29 = vpop.permute.xlu0 %1445 }
 0x444   : > { %v1447_v20 = vsel %vm808_vm5, %v1444_v3, %v1446_v29  ;;  %v1453_v30 = vadd.f32 %v1446_v29, %v1349_v4 }
 0x445   : > { %v1452_v14 = vadd.f32 %v1447_v20, %v1348_v17 }
 0x446   : > { %v1456_v48 = vmul.f32 0.25, %v1453_v30 }
 0x447   : > { %v1455_v39 = vmul.f32 0.25, %v1452_v14 }
 0x448   : > { %1464 = vrot.lane.b32.xlu0 %v1456_v48, %s2399_s28 }
 0x449   : > { %1462 = vrot.lane.b32.xlu2 %v1455_v39, %s2399_s28 }
 0x458   : > { %v1378_v54 = vpop.permute.xlu1 %1377 }
 0x459   : > { %v1385_v57 = vadd.f32 %v1378_v54, %v1346_v28 }
 0x45b   : > { %v1388_v5 = vmul.f32 0.25, %v1385_v57 }
 0x45d   : > { %1396 = vrot.lane.b32.xlu1 %v1388_v5, %s2402_s5 }
 0x460   : > { %v1376_v18 = vpop.permute.xlu0 %1375  ;;  %v1905_v53 = vpop.permute.xlu1 %1904 }
 0x461   : > { %v1379_v41 = vsel %vm721_vm7, %v1376_v18, %v1378_v54  ;;  %v1383_v46 = vadd.f32 %v1376_v18, %v1344_v27  ;;  %v1910_v61 = vsel %vm1048_vm10, %v1905_v53, %v1907_v43 }
 0x462   : > { %v1384_v11 = vadd.f32 %v1379_v41, %v1345_v51  ;;  %2249 = vst [vmem:[%s3176_s7 + $0xb0] sm:$0xff] %v1910_v61 }
 0x463   : > { %v1386_v23 = vmul.f32 0.25, %v1383_v46 }
 0x464   : > { %v1387_v6 = vmul.f32 0.25, %v1384_v11 }
 0x465   : > { %2062 = vrot.lane.b32.xlu1 %v3324_v34, %s2398_s27  ;;  %1392 = vrot.lane.b32.xlu2 %v1386_v23, %s2402_s5  ;;  %v1987_v34 = vmul.f32 0.25, %v3279_v2 }
 0x466   : > { %1394 = vrot.lane.b32.xlu0 %v1387_v6, %s2402_s5  ;;  %s2120_s5 = sshll.u32 %s3176_s7, 4  ;;  %s2121_s5 = int_to_ptr.vmem [resolvable:$true] %s2120_s5 }
 0x467   : > { %v1993_v7 = vadd.f32 %v1990_v44, %v1987_v34 }
 0x468   : > { %v1909_v9 = vpop.permute.xlu0 %1908 }
 0x469   : > { %v1911_v56 = vsel %vm1048_vm10, %v1907_v43, %v1909_v9 }
 0x46a   : > { %2250 = vst [vmem:[%s3176_s7 + $0xb8] sm:$0xff] %v1911_v56 }
 0x46d   : > { %2078 = vrot.lane.b32.xlu1 %v1992_v25, %s2398_s27  ;;  %2064 = vrot.lane.b32.xlu2 %v3294_v36, %s2398_s27 }
 0x46e   : > { %2066 = vrot.lane.b32.xlu0 %v3321_v22, %s2398_s27 }
 0x475   : > { %2080 = vrot.lane.b32.xlu2 %v1993_v7, %s2398_s27 }
 0x476   : > { %2082 = vrot.lane.b32.xlu0 %v1994_v40, %s2398_s27 }
 0x47a   : > { %v2030_v13 = vpop.permute.xlu1 %2029 }
 0x47b   : > { %v2032_v10 = vpop.permute.xlu2 %2031 }
 0x48a   : > { %v1969_v22 = vpop.permute.xlu2 %1968 }
 0x492   : > { %v2034_v36 = vpop.permute.xlu0 %2033 }
 0x493   : > { %v2036_v8 = vsel %vm825_vm9, %v2032_v10, %v2034_v36  ;;  %v2042_v5 = vadd.f32 %v2034_v36, %v1991_v45 }
 0x494   : > { %v2041_v57 = vadd.f32 %v2036_v8, %v1990_v44 }
 0x49a   : > { %v1967_v3 = vpop.permute.xlu1 %1966 }
 0x49b   : > { %v1972_v2 = vsel %vm738_vm12, %v1967_v3, %v1969_v22  ;;  %v1977_v12 = vadd.f32 %v1967_v3, %v3316_v62 }
 0x49c   : > { %v1978_v60 = vadd.f32 %v1972_v2, %v3289_v1 }
 0x49d   : > { %2046 = vrot.lane.b32.xlu1 %v1977_v12, %s2398_s27 }
 0x49e   : > { %2048 = vrot.lane.b32.xlu2 %v1978_v60, %s2398_s27 }
 0x4a1   : > { %v1971_v50 = vpop.permute.xlu0 %1970 }
 0x4a2   : > { %v1973_v19 = vsel %vm738_vm12, %v1969_v22, %v1971_v50  ;;  %v1461_v21 = vpop.permute.xlu1 %1460 }
 0x4a3   : > { %v1979_v35 = vadd.f32 %v1973_v19, %v3306_v33  ;;  %v1463_v49 = vpop.permute.xlu2 %1462 }
 0x4a4   : > { %v1466_v59 = vsel %vm825_vm9, %v1461_v21, %v1463_v49 }
 0x4a5   : > { %2050 = vrot.lane.b32.xlu0 %v1979_v35, %s2398_s27  ;;  %v1471_v38 = vadd.f32 %v1466_v59, %v3383_v31  ;;  %v2035_v31 = vsel %vm825_vm9, %v2030_v13, %v2032_v10 }
 0x4a6   : > { %v2040_v47 = vadd.f32 %v2035_v31, %v1989_v32 }
 0x4a7   : > { %1524 = vrot.lane.b32.xlu1 %v1471_v38, %s2398_s27 }
 0x4ba   : > { %v1465_v1 = vpop.permute.xlu0 %1464 }
 0x4bb   : > { %v1467_v62 = vsel %vm825_vm9, %v1463_v49, %v1465_v1  ;;  %v1473_v63 = vadd.f32 %v1465_v1, %v3397_v37 }
 0x4bc   : > { %v1472_v15 = vadd.f32 %v1467_v62, %v3410_v55 }
 0x4bd   : > { %1528 = vrot.lane.b32.xlu0 %v1473_v63, %s2398_s27 }
 0x4be   : > { %1526 = vrot.lane.b32.xlu2 %v1472_v15, %s2398_s27 }
 0x4bf   : > { %v1393_v33 = vpop.permute.xlu2 %1392 }
 0x4c0   : > { %v1403_v16 = vadd.f32 %v1393_v33, %v3367_v24 }
 0x4c2   : > { %1477 = vrot.lane.b32.xlu1 %v1403_v16, %s2398_s27 }
 0x4c7   : > { %v2065_v4 = vpop.permute.xlu2 %2064 }
 0x4ca   : > { %2094 = vrot.lane.b32.xlu1 %v2040_v47, %s2398_s27 }
 0x4cf   : > { %v1397_v0 = vpop.permute.xlu1 %1396  ;;  %v2081_v14 = vpop.permute.xlu2 %2080 }
 0x4d7   : > { %v2063_v37 = vpop.permute.xlu1 %2062 }
 0x4d8   : > { %v2068_v55 = vsel %vm1048_vm10, %v2063_v37, %v2065_v4  ;;  %v1395_v17 = vpop.permute.xlu0 %1394 }
 0x4d9   : > { %2253 = vst [vmem:[%s3176_s7 + $0xd0] sm:$0xff] %v2068_v55  ;;  %v1398_v29 = vsel %vm738_vm12, %v1393_v33, %v1395_v17  ;;  %v1399_v24 = vsel %vm738_vm12, %v1395_v17, %v1397_v0 }
 0x4da   : > { %v1404_v20 = vadd.f32 %v1398_v29, %v3394_v26  ;;  %v1405_v30 = vadd.f32 %v1399_v24, %v3379_v42 }
 0x4dc   : > { %1481 = vrot.lane.b32.xlu0 %v1405_v30, %s2398_s27  ;;  %1479 = vrot.lane.b32.xlu2 %v1404_v20, %s2398_s27 }
 0x4df   : > { %v2079_v48 = vpop.permute.xlu1 %2078 }
 0x4e0   : > { %v2084_v39 = vsel %vm1048_vm10, %v2079_v48, %v2081_v14  ;;  %v2067_v28 = vpop.permute.xlu0 %2066 }
 0x4e1   : > { %2255 = vst [vmem:[%s3176_s7 + $0xe0] sm:$0xff] %v2084_v39  ;;  %v2069_v54 = vsel %vm1048_vm10, %v2065_v4, %v2067_v28 }
 0x4e2   : > { %2254 = vst [vmem:[%s3176_s7 + $0xd8] sm:$0xff] %v2069_v54 }
 0x4e4   : > { %2098 = vrot.lane.b32.xlu0 %v2042_v5, %s2398_s27  ;;  %2096 = vrot.lane.b32.xlu2 %v2041_v57, %s2398_s27 }
 0x4e8   : > { %v2083_v42 = vpop.permute.xlu0 %2082 }
 0x4e9   : > { %v2085_v26 = vsel %vm1048_vm10, %v2081_v14, %v2083_v42 }
 0x4ea   : > { %2256 = vst [vmem:[%s3176_s7 + $0xe8] sm:$0xff] %v2085_v26 }
 0x4f8   : > { %v2049_v43 = vpop.permute.xlu2 %2048 }
 0x50f   : > { %v2047_v27 = vpop.permute.xlu1 %2046 }
 0x510   : > { %v2052_v51 = vsel %vm1048_vm10, %v2047_v27, %v2049_v43 }
 0x511   : > { %2251 = vst [vmem:[%s3176_s7 + $0xc0] sm:$0xff] %v2052_v51 }
 0x517   : > { %v2051_v18 = vpop.permute.xlu0 %2050 }
 0x518   : > { %v2053_v53 = vsel %vm1048_vm10, %v2049_v43, %v2051_v18  ;;  %v1527_v41 = vpop.permute.xlu2 %1526 }
 0x519   : > { %2252 = vst [vmem:[%s3176_s7 + $0xc8] sm:$0xff] %v2053_v53  ;;  %v1525_v46 = vpop.permute.xlu1 %1524 }
 0x51a   : > { %v1530_v61 = vsel %vm1048_vm10, %v1525_v46, %v1527_v41 }
 0x51b   : > { %2233 = vst [vmem:[%s3176_s7 + $0x30] sm:$0xff] %v1530_v61 }
 0x52f   : > { %v1529_v11 = vpop.permute.xlu0 %1528 }
 0x530   : > { %v1531_v23 = vsel %vm1048_vm10, %v1527_v41, %v1529_v11 }
 0x531   : > { %2234 = vst [vmem:[%s3176_s7 + $0x38] sm:$0xff] %v1531_v23 }
 0x534   : > { %v1478_v6 = vpop.permute.xlu1 %1477 }
 0x536   : > { %v1480_v52 = vpop.permute.xlu2 %1479 }
 0x537   : > { %v1483_v9 = vsel %vm1048_vm10, %v1478_v6, %v1480_v52 }
 0x538   : > { %1487 = vst [vmem:[%s3176_s7] sm:$0xff] %v1483_v9 }
 0x53c   : > { %v2095_v32 = vpop.permute.xlu1 %2094 }
 0x53e   : > { %v2097_v56 = vpop.permute.xlu2 %2096 }
 0x53f   : > { %v2100_v25 = vsel %vm1048_vm10, %v2095_v32, %v2097_v56 }
 0x540   : > { %2257 = vst [vmem:[%s3176_s7 + $0xf0] sm:$0xff] %v2100_v25 }
 0x54e   : > { %v1482_v34 = vpop.permute.xlu0 %1481 }
 0x54f   : > { %v1484_v58 = vsel %vm1048_vm10, %v1480_v52, %v1482_v34 }
 0x550   : > { %1488 = vst [vmem:[%s3176_s7 + $0x8] sm:$0xff] %v1484_v58 }
 0x556   : > { %v2099_v44 = vpop.permute.xlu0 %2098 }
 0x557   : > { %v2101_v45 = vsel %vm1048_vm10, %v2097_v56, %v2099_v44 }
 0x558   : > { %2258 = vst [vmem:[%s3176_s7 + $0xf8] sm:$0xff] %v2101_v45 }
 0x559   : > { %2353 = shalt.err (!%p2350_p3)
}
 0x55a   : > { %s2405_s30 = smov 256  }
 0x55b   : > { %2268 = dma.vmem_to_hbm [thread:$0]  (%p2469_p5), %s2121_s5, 4096, %s2123_s8, %s2108_s9, %s2405_s30, %s2405_s30, %s2391_s13  }
 0x55c PF: > { %p2274_p4 = scmp.ge.s32.totalorder %s2388_s18, 2  ;;  %s2137_s6 = sand.u32 1, %s2376_s15  }
 0x55d   : > { %s2138_s7 = scalar_lea.sflag [#allocation6], %s2137_s6 }
 0x55e   : > { %p2271_p7 = pnand %p2274_p4, %p2473_p6 }
 0x560   : > { %p2272_p8 = pneg %p2271_p7 }
 0x562   : > { %2371 = dma.done.wait (%p2272_p8), %s2138_s7, 4096  }
 0x563   : > { %2373 = vsyncadd (%p2272_p8), %s2138_s7, 4294963200  ;;  %p14_p9 = scmp.ge.s32.totalorder %s2456_s21, 4   ;;  %s3664_s15 = smov %s2380_s16 }
 0x564   : > { %s3665_s16 = smov %s2384_s17  ;;  %s3666_s17 = smov %s2467_s24 }
 0x565   : > { %s3667_s18 = smov %s2456_s21  ;;  %16 = sbr.rel (!%p14_p9) target bundleno = 3 (0x3), region = 89 }
 0x56a   :  { %2144 = vsyncpa [#allocation6], 1 }
 0x56b   :  { %2146 = vsyncpa [#allocation6 + $0x1], 1 }

</bundles_post_ra>
